<compile_context>
chip_gen: v5e
topology: v5e:2x2
jax: 0.10.0
libtpu: 0.0.40
codegen_flags: <defaults>
</compile_context>

<pallas_src>
import functools

import jax
import jax.numpy as jnp
from jax import lax
from jax.experimental import pallas as pl
from jax.experimental.pallas import tpu as pltpu


_BLOCK_BUDGET_BYTES = 2 * 1024 * 1024      # ~2 MiB HBM blocks: ~85% roofline measured
_MIN_SPLIT_BLOCK_BYTES = 1 * 1024 * 1024   # keep >= 1 MiB per block when splitting for 2 TCs
_GROUP_TARGET_BYTES = 64 * 1024            # f32 working set per row group (fits 64x4KiB vregs)


def _round_down(x, m):
    return (x // m) * m


def _cdiv(a, b):
    return -(-a // b)


def _num_tensorcores():
    """v7x has 2 TensorCores per chip; v5e / v6e have 1."""
    try:
        kind = jax.devices()[0].device_kind.lower()
    except Exception:
        return 1
    return 2 if ("v7" in kind or "7x" in kind) else 1


def _instance_norm_kernel(x_ref, o_ref, *, eps, group_rows, unroll):
    """Normalize each row of the (row_tile, L) block over its last axis.

    Rows are processed in `group_rows`-sized groups so temporaries stay in
    vregs: one VMEM read + one VMEM write per element, no full-block spills.
    """
    length = x_ref.shape[-1]
    inv_l = jnp.float32(1.0 / length)
    eps_f = jnp.float32(eps)

    def normalize(xs):
        xs = xs.astype(jnp.float32)
        mean = jnp.sum(xs, axis=-1, keepdims=True) * inv_l
        d = xs - mean                                      # centered: no E[x^2] cancellation
        var = jnp.sum(d * d, axis=-1, keepdims=True) * inv_l
        return d * lax.rsqrt(var + eps_f)                  # rsqrt on the EUP slot

    row_tile = x_ref.shape[0]
    if group_rows >= row_tile:
        o_ref[...] = normalize(x_ref[...]).astype(o_ref.dtype)
        return

    n_groups = row_tile // group_rows                      # exact by construction

    def body(g, carry):
        r0 = pl.multiple_of(g * group_rows, group_rows)    # sublane-aligned dynamic start
        sl = pl.ds(r0, group_rows)
        o_ref[sl, :] = normalize(x_ref[sl, :]).astype(o_ref.dtype)
        return carry

    lax.fori_loop(0, n_groups, body, 0, unroll=unroll)


def _pick_tiling(rows, length, itemsize, num_cores):
    """Return (row_tile, group_rows, unroll) for a (rows, length) problem."""
    # Native packed sublane tiles: f32 (8,128), bf16 (16,128), int8/fp8 (32,128).
    gran = max(8, 32 // itemsize)
    if rows <= gran:
        return rows, rows, True                            # one full-extent block

    rows_floor = _round_down(rows, gran)                   # >= gran

    # Row group: largest power-of-two multiple of `gran` whose f32 working set
    # stays comfortably inside the vreg file.
    group_rows = gran
    while (group_rows * 2 <= rows_floor
           and group_rows * 2 * length * 4 <= _GROUP_TARGET_BYTES):
        group_rows *= 2

    # Block: as many groups as fit the ~2 MiB budget, never exceeding the
    # gran-aligned row count (last grid block may be partial / masked).
    group_bytes = group_rows * length * itemsize
    groups = min(rows_floor // group_rows,
                 max(1, _BLOCK_BUDGET_BYTES // max(1, group_bytes)))

    # v7x (2 TCs): prefer >= 4 "parallel" grid steps (double-buffered pipeline
    # per core) but only while each block stays >= ~1 MiB.  v5e/v6e never split.
    if num_cores > 1:
        while (groups > 1
               and _cdiv(rows, group_rows * groups) < 4
               and (groups // 2) * group_bytes >= _MIN_SPLIT_BLOCK_BYTES):
            groups //= 2

    if groups <= 8:
        unroll = True
    elif groups % 2 == 0:
        unroll = 2
    else:
        unroll = 1
    return group_rows * groups, group_rows, unroll


@functools.partial(jax.jit, static_argnames=("eps",))
def learnable_in(x, eps=1e-5):
    """LearnableIN forward.  x: (N, C, L) or (C, L).  Returns same shape."""
    squeeze = x.ndim == 2
    if squeeze:
        x = x[None]
    n, c, length = x.shape

    if length <= 1:                                        # module pass-through
        out = x
        return out[0] if squeeze else out

    rows = n * c
    x2 = x.reshape(rows, length)                           # free contiguous reshape
    row_tile, group_rows, unroll = _pick_tiling(
        rows, length, x2.dtype.itemsize, _num_tensorcores())
    grid = (_cdiv(rows, row_tile),)

    out = pl.pallas_call(
        functools.partial(_instance_norm_kernel, eps=eps,
                          group_rows=group_rows, unroll=unroll),
        out_shape=jax.ShapeDtypeStruct((rows, length), x.dtype),
        grid=grid,
        in_specs=[pl.BlockSpec((row_tile, length), lambda r: (r, 0))],
        out_specs=pl.BlockSpec((row_tile, length), lambda r: (r, 0)),
        compiler_params=pltpu.CompilerParams(
            dimension_semantics=("parallel",)),
    )(x2)

    out = out.reshape(n, c, length)
    return out[0] if squeeze else out


def _reference(x, eps=1e-5):
    """Pure-JAX reference mirroring training-mode nn.InstanceNorm1d (no affine)."""
    x32 = x.astype(jnp.float32)
    mean = jnp.mean(x32, axis=-1, keepdims=True)
    var = jnp.mean((x32 - mean) ** 2, axis=-1, keepdims=True)   # biased variance
    return ((x32 - mean) / jnp.sqrt(var + eps)).astype(x.dtype)


if __name__ == "__main__":
    key = jax.random.PRNGKey(0)
    k0, k1, k2, k3 = jax.random.split(key, 4)

    # (N, C, L) with the module's default dim=256 channels.
    N, C, L = 2, 256, 128
    x = jax.random.normal(k0, (N, C, L), jnp.float32) * 1.7 + 0.3
    out = jax.block_until_ready(learnable_in(x))
    assert out.shape == (N, C, L)
    assert jnp.allclose(out, _reference(x), atol=1e-4, rtol=1e-4), "f32 3D mismatch"

    # 2-D (C, L) input, L not a multiple of 128 (lane-masked store path).
    x2d = jax.random.normal(k1, (C, 96), jnp.float32)
    out2d = jax.block_until_ready(learnable_in(x2d))
    assert jnp.allclose(out2d, _reference(x2d), atol=1e-4, rtol=1e-4), "f32 2D mismatch"

    # Ragged rows (partial last grid block) and tiny L.
    x_odd = jax.random.normal(k2, (12, 20), jnp.float32)
    out_odd = jax.block_until_ready(learnable_in(x_odd))
    assert jnp.allclose(out_odd, _reference(x_odd), atol=1e-4, rtol=1e-4), "ragged mismatch"

    # bf16 path (16-row sublane granularity, f32 statistics).
    xb = (jax.random.normal(k3, (N, C, 192), jnp.float32) * 2.0).astype(jnp.bfloat16)
    outb = jax.block_until_ready(learnable_in(xb))
    refb = _reference(xb.astype(jnp.float32))
    assert jnp.allclose(outb.astype(jnp.float32), refb, atol=5e-2, rtol=5e-2), "bf16 mismatch"

    # L <= 1 pass-through branch.
    x1 = jax.random.normal(k2, (N, C, 1), jnp.float32)
    assert jnp.array_equal(jax.block_until_ready(learnable_in(x1)), x1)

    print("KERNEL_OK")
</pallas_src>

<mosaic_0001>
module attributes {stable_mosaic.version = 11 : i64} {
  func.func @_instance_norm_kernel(%arg0: i32, %arg1: memref<512x128xf32, #tpu.memory_space<vmem>>, %arg2: memref<512x128xf32, #tpu.memory_space<vmem>>) attributes {dimension_semantics = [#tpu.dimension_semantics<parallel>], iteration_bounds = array<i64: 1>, scalar_prefetch = 0 : i64, scratch_operands = 0 : i64, tpu.core_type = #tpu.core_type<tc>, window_params = [{transform_indices = @transform_0, window_bounds = array<i64: 512, 128>}, {transform_indices = @transform_1, window_bounds = array<i64: 512, 128>}]} {
    %cst = arith.constant 7.812500e-03 : f32
    %cst_0 = arith.constant 9.99999974E-6 : f32
    %c0_i32 = arith.constant 0 : i32
    %c128_i32 = arith.constant 128 : i32
    %0 = arith.muli %c0_i32, %c128_i32 : i32
    %1 = tpu.assume_multiple %0, 128 : i32
    %2 = arith.index_cast %1 : i32 to index
    %c0 = arith.constant 0 : index
    %3 = vector.load %arg1[%2, %c0] : memref<512x128xf32, #tpu.memory_space<vmem>>, vector<128x128xf32>
    %cst_1 = arith.constant dense<0.000000e+00> : vector<128xf32>
    %4 = vector.multi_reduction <add>, %3, %cst_1 [1] : vector<128x128xf32> to vector<128xf32>
    %5 = vector.shape_cast %4 : vector<128xf32> to vector<128x1xf32>
    %6 = vector.broadcast %cst : f32 to vector<128x1xf32>
    %7 = arith.mulf %5, %6 : vector<128x1xf32>
    %8 = vector.broadcast %7 : vector<128x1xf32> to vector<128x128xf32>
    %9 = arith.subf %3, %8 : vector<128x128xf32>
    %10 = arith.mulf %9, %9 : vector<128x128xf32>
    %cst_2 = arith.constant dense<0.000000e+00> : vector<128xf32>
    %11 = vector.multi_reduction <add>, %10, %cst_2 [1] : vector<128x128xf32> to vector<128xf32>
    %12 = vector.shape_cast %11 : vector<128xf32> to vector<128x1xf32>
    %13 = vector.broadcast %cst : f32 to vector<128x1xf32>
    %14 = arith.mulf %12, %13 : vector<128x1xf32>
    %15 = vector.broadcast %cst_0 : f32 to vector<128x1xf32>
    %16 = arith.addf %14, %15 : vector<128x1xf32>
    %17 = math.rsqrt %16 : vector<128x1xf32>
    %18 = vector.broadcast %17 : vector<128x1xf32> to vector<128x128xf32>
    %19 = arith.mulf %9, %18 : vector<128x128xf32>
    %20 = arith.index_cast %1 : i32 to index
    %c0_3 = arith.constant 0 : index
    %21 = vector.load %arg2[%20, %c0_3] : memref<512x128xf32, #tpu.memory_space<vmem>>, vector<128x128xf32>
    tpu.vector_store %arg2[%20, %c0_3], %19 {strides = array<i32>} : memref<512x128xf32, #tpu.memory_space<vmem>>, vector<128x128xf32>,
    %c1_i32 = arith.constant 1 : i32
    %c128_i32_4 = arith.constant 128 : i32
    %22 = arith.muli %c1_i32, %c128_i32_4 : i32
    %23 = tpu.assume_multiple %22, 128 : i32
    %24 = arith.index_cast %23 : i32 to index
    %c0_5 = arith.constant 0 : index
    %25 = vector.load %arg1[%24, %c0_5] : memref<512x128xf32, #tpu.memory_space<vmem>>, vector<128x128xf32>
    %cst_6 = arith.constant dense<0.000000e+00> : vector<128xf32>
    %26 = vector.multi_reduction <add>, %25, %cst_6 [1] : vector<128x128xf32> to vector<128xf32>
    %27 = vector.shape_cast %26 : vector<128xf32> to vector<128x1xf32>
    %28 = vector.broadcast %cst : f32 to vector<128x1xf32>
    %29 = arith.mulf %27, %28 : vector<128x1xf32>
    %30 = vector.broadcast %29 : vector<128x1xf32> to vector<128x128xf32>
    %31 = arith.subf %25, %30 : vector<128x128xf32>
    %32 = arith.mulf %31, %31 : vector<128x128xf32>
    %cst_7 = arith.constant dense<0.000000e+00> : vector<128xf32>
    %33 = vector.multi_reduction <add>, %32, %cst_7 [1] : vector<128x128xf32> to vector<128xf32>
    %34 = vector.shape_cast %33 : vector<128xf32> to vector<128x1xf32>
    %35 = vector.broadcast %cst : f32 to vector<128x1xf32>
    %36 = arith.mulf %34, %35 : vector<128x1xf32>
    %37 = vector.broadcast %cst_0 : f32 to vector<128x1xf32>
    %38 = arith.addf %36, %37 : vector<128x1xf32>
    %39 = math.rsqrt %38 : vector<128x1xf32>
    %40 = vector.broadcast %39 : vector<128x1xf32> to vector<128x128xf32>
    %41 = arith.mulf %31, %40 : vector<128x128xf32>
    %42 = arith.index_cast %23 : i32 to index
    %c0_8 = arith.constant 0 : index
    %43 = vector.load %arg2[%42, %c0_8] : memref<512x128xf32, #tpu.memory_space<vmem>>, vector<128x128xf32>
    tpu.vector_store %arg2[%42, %c0_8], %41 {strides = array<i32>} : memref<512x128xf32, #tpu.memory_space<vmem>>, vector<128x128xf32>,
    %c2_i32 = arith.constant 2 : i32
    %c128_i32_9 = arith.constant 128 : i32
    %44 = arith.muli %c2_i32, %c128_i32_9 : i32
    %45 = tpu.assume_multiple %44, 128 : i32
    %46 = arith.index_cast %45 : i32 to index
    %c0_10 = arith.constant 0 : index
    %47 = vector.load %arg1[%46, %c0_10] : memref<512x128xf32, #tpu.memory_space<vmem>>, vector<128x128xf32>
    %cst_11 = arith.constant dense<0.000000e+00> : vector<128xf32>
    %48 = vector.multi_reduction <add>, %47, %cst_11 [1] : vector<128x128xf32> to vector<128xf32>
    %49 = vector.shape_cast %48 : vector<128xf32> to vector<128x1xf32>
    %50 = vector.broadcast %cst : f32 to vector<128x1xf32>
    %51 = arith.mulf %49, %50 : vector<128x1xf32>
    %52 = vector.broadcast %51 : vector<128x1xf32> to vector<128x128xf32>
    %53 = arith.subf %47, %52 : vector<128x128xf32>
    %54 = arith.mulf %53, %53 : vector<128x128xf32>
    %cst_12 = arith.constant dense<0.000000e+00> : vector<128xf32>
    %55 = vector.multi_reduction <add>, %54, %cst_12 [1] : vector<128x128xf32> to vector<128xf32>
    %56 = vector.shape_cast %55 : vector<128xf32> to vector<128x1xf32>
    %57 = vector.broadcast %cst : f32 to vector<128x1xf32>
    %58 = arith.mulf %56, %57 : vector<128x1xf32>
    %59 = vector.broadcast %cst_0 : f32 to vector<128x1xf32>
    %60 = arith.addf %58, %59 : vector<128x1xf32>
    %61 = math.rsqrt %60 : vector<128x1xf32>
    %62 = vector.broadcast %61 : vector<128x1xf32> to vector<128x128xf32>
    %63 = arith.mulf %53, %62 : vector<128x128xf32>
    %64 = arith.index_cast %45 : i32 to index
    %c0_13 = arith.constant 0 : index
    %65 = vector.load %arg2[%64, %c0_13] : memref<512x128xf32, #tpu.memory_space<vmem>>, vector<128x128xf32>
    tpu.vector_store %arg2[%64, %c0_13], %63 {strides = array<i32>} : memref<512x128xf32, #tpu.memory_space<vmem>>, vector<128x128xf32>,
    %c3_i32 = arith.constant 3 : i32
    %c128_i32_14 = arith.constant 128 : i32
    %66 = arith.muli %c3_i32, %c128_i32_14 : i32
    %67 = tpu.assume_multiple %66, 128 : i32
    %68 = arith.index_cast %67 : i32 to index
    %c0_15 = arith.constant 0 : index
    %69 = vector.load %arg1[%68, %c0_15] : memref<512x128xf32, #tpu.memory_space<vmem>>, vector<128x128xf32>
    %cst_16 = arith.constant dense<0.000000e+00> : vector<128xf32>
    %70 = vector.multi_reduction <add>, %69, %cst_16 [1] : vector<128x128xf32> to vector<128xf32>
    %71 = vector.shape_cast %70 : vector<128xf32> to vector<128x1xf32>
    %72 = vector.broadcast %cst : f32 to vector<128x1xf32>
    %73 = arith.mulf %71, %72 : vector<128x1xf32>
    %74 = vector.broadcast %73 : vector<128x1xf32> to vector<128x128xf32>
    %75 = arith.subf %69, %74 : vector<128x128xf32>
    %76 = arith.mulf %75, %75 : vector<128x128xf32>
    %cst_17 = arith.constant dense<0.000000e+00> : vector<128xf32>
    %77 = vector.multi_reduction <add>, %76, %cst_17 [1] : vector<128x128xf32> to vector<128xf32>
    %78 = vector.shape_cast %77 : vector<128xf32> to vector<128x1xf32>
    %79 = vector.broadcast %cst : f32 to vector<128x1xf32>
    %80 = arith.mulf %78, %79 : vector<128x1xf32>
    %81 = vector.broadcast %cst_0 : f32 to vector<128x1xf32>
    %82 = arith.addf %80, %81 : vector<128x1xf32>
    %83 = math.rsqrt %82 : vector<128x1xf32>
    %84 = vector.broadcast %83 : vector<128x1xf32> to vector<128x128xf32>
    %85 = arith.mulf %75, %84 : vector<128x128xf32>
    %86 = arith.index_cast %67 : i32 to index
    %c0_18 = arith.constant 0 : index
    %87 = vector.load %arg2[%86, %c0_18] : memref<512x128xf32, #tpu.memory_space<vmem>>, vector<128x128xf32>
    tpu.vector_store %arg2[%86, %c0_18], %85 {strides = array<i32>} : memref<512x128xf32, #tpu.memory_space<vmem>>, vector<128x128xf32>,
    %c4_i32 = arith.constant 4 : i32
    return
  }
  func.func @transform_0(%arg0: i32) -> (i32, i32) {
    %c0_i32 = arith.constant 0 : i32
    %c0_i32_0 = arith.constant 0 : i32
    return %arg0, %c0_i32 : i32, i32
  }
  func.func @transform_1(%arg0: i32) -> (i32, i32) {
    %c0_i32 = arith.constant 0 : i32
    %c0_i32_0 = arith.constant 0 : i32
    return %arg0, %c0_i32 : i32, i32
  }
}

</mosaic_0001>

<bundles_post_ra>
// kernel: learnable_in.1
= control target key start
LH: loop header
LB: loop body
LE: loop exit
PB: predicated region body
PF: predicated region fallthrough
CT: control target
= control target key end

     0   :  { %6 = vsyncpa [#allocation3], 0  ;;  %s2885_s0 = inlined_call_operand.hbm [shape: f32[512,128], index: 0, kind: input, shape index: {}]   ;;  %s2886_s1 = inlined_call_operand.hbm [shape: f32[512,128], index: 1, kind: output, shape index: {}]  }
   0x1   :  { %7 = vsyncpa [#allocation4], 0  ;;  %s12_s8 = sshll.u32 %s2885_s0, 4  ;;  %s1655_s9 = smov [#allocation2]   ;;  %s13_s8 = int_to_ptr.hbm [resolvable:$true] %s12_s8 }
   0x2   :  { %s14_s10 = sshll.u32 %s1655_s9, 4  ;;  %s1656_s11 = smov 128   ;;  %s15_s10 = int_to_ptr.vmem [resolvable:$true] %s14_s10 }
   0x3   :  { %s1657_s12 = smov 8  }
   0x4   :  { %20 = dma.hbm_to_vmem [thread:$0]  %s13_s8, 8192, %s15_s10, [#allocation3], %s1656_s11, %s1656_s11, %s1657_s12  }
   0x5   :  { %1651 = dma.done.wait [#allocation3], 8192  }
   0x6   :  { %1652 = vsyncadd [#allocation3], 4294959104  ;;  %v1675_v0 = vld [vmem:[#allocation2 + $0x20] sm:$0xff]  ;;  %v1677_v1 = vld [vmem:[#allocation2 + $0x10] sm:$0xff]  ;;  %s1658_s0 = smov [#allocation5]   ;;  %s1445_s16 = sshll.u32 %s2886_s1, 4  ;;  %s1446_s16 = int_to_ptr.hbm [resolvable:$true] %s1445_s16 }
   0x7   :  { %v1679_v2 = vld [vmem:[#allocation2] sm:$0xff]  ;;  %49 = vadd.xlane.f32.xlu2 %v1675_v0  ;;  %45 = vadd.xlane.f32.xlu1 %v1677_v1  ;;  %v1684_v3 = vld [vmem:[#allocation2 + $0x28] sm:$0xff]  ;;  %v1686_v4 = vld [vmem:[#allocation2 + $0x18] sm:$0xff]  ;;  %s1443_s13 = sshll.u32 %s1658_s0, 4  ;;  %s1444_s13 = int_to_ptr.vmem [resolvable:$true] %s1443_s13 }
   0x8   :  { %41 = vadd.xlane.f32.xlu0 %v1679_v2  ;;  %v1688_v5 = vld [vmem:[#allocation2 + $0x8] sm:$0xff]  ;;  %v1693_v6 = vld [vmem:[#allocation2 + $0x40] sm:$0xff]  ;;  %v1695_v7 = vld [vmem:[#allocation2 + $0x38] sm:$0xff] }
   0x9   :  { %v1697_v8 = vld [vmem:[#allocation2 + $0x30] sm:$0xff]  ;;  %v1702_v9 = vld [vmem:[#allocation2 + $0x58] sm:$0xff]  ;;  %v1706_v11 = vld [vmem:[#allocation2 + $0x48] sm:$0xff] }
   0xa   :  { %v1704_v10 = vld [vmem:[#allocation2 + $0x50] sm:$0xff]  ;;  %v1713_v13 = vld [vmem:[#allocation2 + $0x68] sm:$0xff]  ;;  %v1715_v14 = vld [vmem:[#allocation2 + $0x60] sm:$0xff] }
   0xb   :  { %v1711_v12 = vld [vmem:[#allocation2 + $0x70] sm:$0xff]  ;;  %v1720_v15 = vld [vmem:[#allocation2 + $0x80] sm:$0xff]  ;;  %v1724_v17 = vld [vmem:[#allocation2 + $0x78] sm:$0xff] }
   0xc   :  { %v1722_v16 = vld [vmem:[#allocation2 + $0x90] sm:$0xff]  ;;  %v1729_v18 = vld [vmem:[#allocation2 + $0x98] sm:$0xff]  ;;  %v1731_v19 = vld [vmem:[#allocation2 + $0xa8] sm:$0xff] }
   0xd   :  { %v1733_v20 = vld [vmem:[#allocation2 + $0x88] sm:$0xff]  ;;  %v1738_v21 = vld [vmem:[#allocation2 + $0xb0] sm:$0xff]  ;;  %v1740_v22 = vld [vmem:[#allocation2 + $0xc0] sm:$0xff] }
   0xe   :  { %v1742_v23 = vld [vmem:[#allocation2 + $0xa0] sm:$0xff]  ;;  %v1747_v24 = vld [vmem:[#allocation2 + $0xc8] sm:$0xff]  ;;  %v1749_v25 = vld [vmem:[#allocation2 + $0xd8] sm:$0xff] }
   0xf   :  { %51 = vadd.xlane.f32.xlu2 %v1684_v3  ;;  %47 = vadd.xlane.f32.xlu1 %v1686_v4  ;;  %v1751_v26 = vld [vmem:[#allocation2 + $0xb8] sm:$0xff]  ;;  %v1756_v27 = vld [vmem:[#allocation2 + $0xe0] sm:$0xff]  ;;  %v1758_v28 = vld [vmem:[#allocation2 + $0xf0] sm:$0xff] }
  0x10   :  { %43 = vadd.xlane.f32.xlu0 %v1688_v5  ;;  %v1760_v29 = vld [vmem:[#allocation2 + $0xd0] sm:$0xff]  ;;  %v1765_v30 = vld [vmem:[#allocation2 + $0xf8] sm:$0xff]  ;;  %v1767_v31 = vld [vmem:[#allocation2 + $0xe8] sm:$0xff] }
  0x17   :  { %57 = vadd.xlane.f32.xlu2 %v1693_v6  ;;  %55 = vadd.xlane.f32.xlu1 %v1695_v7 }
  0x18   :  { %53 = vadd.xlane.f32.xlu0 %v1697_v8 }
  0x1f   :  { %63 = vadd.xlane.f32.xlu2 %v1702_v9  ;;  %61 = vadd.xlane.f32.xlu1 %v1704_v10 }
  0x20   :  { %59 = vadd.xlane.f32.xlu0 %v1706_v11 }
  0x27   :  { %69 = vadd.xlane.f32.xlu2 %v1711_v12  ;;  %67 = vadd.xlane.f32.xlu1 %v1713_v13 }
  0x28   :  { %65 = vadd.xlane.f32.xlu0 %v1715_v14 }
  0x2f   :  { %394 = vadd.xlane.f32.xlu2 %v1720_v15  ;;  %398 = vadd.xlane.f32.xlu1 %v1722_v16 }
  0x30   :  { %71 = vadd.xlane.f32.xlu0 %v1724_v17 }
  0x37   :  { %400 = vadd.xlane.f32.xlu2 %v1729_v18  ;;  %404 = vadd.xlane.f32.xlu1 %v1731_v19 }
  0x38   :  { %396 = vadd.xlane.f32.xlu0 %v1733_v20 }
  0x3f   :  { %406 = vadd.xlane.f32.xlu2 %v1738_v21  ;;  %410 = vadd.xlane.f32.xlu1 %v1740_v22 }
  0x40   :  { %402 = vadd.xlane.f32.xlu0 %v1742_v23 }
  0x47   :  { %412 = vadd.xlane.f32.xlu2 %v1747_v24  ;;  %416 = vadd.xlane.f32.xlu1 %v1749_v25 }
  0x48   :  { %408 = vadd.xlane.f32.xlu0 %v1751_v26 }
  0x4f   :  { %418 = vadd.xlane.f32.xlu2 %v1756_v27  ;;  %422 = vadd.xlane.f32.xlu1 %v1758_v28 }
  0x50   :  { %414 = vadd.xlane.f32.xlu0 %v1760_v29 }
  0x57   :  { %424 = vadd.xlane.f32.xlu2 %v1765_v30 }
  0x58   :  { %420 = vadd.xlane.f32.xlu0 %v1767_v31 }
  0x7a   :  { %v50_v32 = vpop.xlane.xlu2 %49  ;;  %v46_v33 = vpop.xlane.xlu1 %45 }
  0x7b   :  { %v75_v34 = vmul.f32 0.0078125, %v46_v33  ;;  %v42_v35 = vpop.xlane.xlu0 %41  ;;  %v77_v52 = vmul.f32 0.0078125, %v50_v32 }
  0x7c   :  { %v73_v36 = vmul.f32 0.0078125, %v42_v35 }
  0x7d   :  { %v1772_v37 = vsub.f32 %v1677_v1, %v75_v34  ;;  %v1797_v58 = vsub.f32 %v1675_v0, %v77_v52 }
  0x7e   :  { %v1775_v38 = vsub.f32 %v1679_v2, %v73_v36 }
  0x7f   :  { %v107_v39 = vmul.f32 %v1772_v37, %v1772_v37  ;;  %v109_v1 = vmul.f32 %v1797_v58, %v1797_v58 }
  0x80   :  { %v105_v40 = vmul.f32 %v1775_v38, %v1775_v38 }
  0x81   :  { %125 = vadd.xlane.f32.xlu0 %v107_v39 }
  0x82   :  { %121 = vadd.xlane.f32.xlu1 %v105_v40  ;;  %v52_v41 = vpop.xlane.xlu2 %51  ;;  %v48_v42 = vpop.xlane.xlu1 %47 }
  0x83   :  { %v78_v43 = vmul.f32 0.0078125, %v52_v41  ;;  %v76_v44 = vmul.f32 0.0078125, %v48_v42  ;;  %v44_v45 = vpop.xlane.xlu0 %43 }
  0x84   :  { %v74_v46 = vmul.f32 0.0078125, %v44_v45 }
  0x85   :  { %v1782_v47 = vsub.f32 %v1684_v3, %v78_v43  ;;  %v1785_v48 = vsub.f32 %v1686_v4, %v76_v44 }
  0x86   :  { %v1788_v49 = vsub.f32 %v1688_v5, %v74_v46 }
  0x87   :  { %v110_v50 = vmul.f32 %v1782_v47, %v1782_v47  ;;  %v108_v51 = vmul.f32 %v1785_v48, %v1785_v48 }
  0x88   :  { %v106_v53 = vmul.f32 %v1788_v49, %v1788_v49 }
  0x89   :  { %131 = vadd.xlane.f32.xlu0 %v110_v50 }
  0x8a   :  { %127 = vadd.xlane.f32.xlu1 %v108_v51  ;;  %123 = vadd.xlane.f32.xlu2 %v106_v53  ;;  %v58_v54 = vpop.xlane.xlu2 %57  ;;  %v56_v55 = vpop.xlane.xlu1 %55 }
  0x8b   :  { %v81_v56 = vmul.f32 0.0078125, %v58_v54  ;;  %v54_v57 = vpop.xlane.xlu0 %53  ;;  %v80_v62 = vmul.f32 0.0078125, %v56_v55 }
  0x8c   :  { %v79_v59 = vmul.f32 0.0078125, %v54_v57 }
  0x8d   :  { %v1800_v60 = vsub.f32 %v1693_v6, %v81_v56  ;;  %v1812_v3 = vsub.f32 %v1695_v7, %v80_v62 }
  0x8e   :  { %v1803_v61 = vsub.f32 %v1697_v8, %v79_v59 }
  0x8f   :  { %v113_v63 = vmul.f32 %v1800_v60, %v1800_v60  ;;  %v112_v34 = vmul.f32 %v1812_v3, %v1812_v3 }
  0x90   :  { %v111_v2 = vmul.f32 %v1803_v61, %v1803_v61 }
  0x91   :  { %137 = vadd.xlane.f32.xlu0 %v113_v63 }
  0x92   :  { %129 = vadd.xlane.f32.xlu2 %v109_v1  ;;  %133 = vadd.xlane.f32.xlu1 %v111_v2  ;;  %v64_v0 = vpop.xlane.xlu2 %63  ;;  %v62_v4 = vpop.xlane.xlu1 %61 }
  0x93   :  { %v84_v5 = vmul.f32 0.0078125, %v64_v0  ;;  %v60_v6 = vpop.xlane.xlu0 %59  ;;  %v83_v35 = vmul.f32 0.0078125, %v62_v4 }
  0x94   :  { %v82_v8 = vmul.f32 0.0078125, %v60_v6 }
  0x95   :  { %v1815_v32 = vsub.f32 %v1702_v9, %v84_v5  ;;  %v1827_v9 = vsub.f32 %v1704_v10, %v83_v35 }
  0x96   :  { %v1818_v33 = vsub.f32 %v1706_v11, %v82_v8 }
  0x97   :  { %v116_v36 = vmul.f32 %v1815_v32, %v1815_v32  ;;  %v115_v45 = vmul.f32 %v1827_v9, %v1827_v9 }
  0x98   :  { %v114_v7 = vmul.f32 %v1818_v33, %v1818_v33 }
  0x99   :  { %143 = vadd.xlane.f32.xlu0 %v116_v36 }
  0x9a   :  { %135 = vadd.xlane.f32.xlu2 %v112_v34  ;;  %139 = vadd.xlane.f32.xlu1 %v114_v7  ;;  %v70_v39 = vpop.xlane.xlu2 %69  ;;  %v68_v40 = vpop.xlane.xlu1 %67 }
  0x9b   :  { %v87_v11 = vmul.f32 0.0078125, %v70_v39  ;;  %v66_v41 = vpop.xlane.xlu0 %65  ;;  %v86_v46 = vmul.f32 0.0078125, %v68_v40 }
  0x9c   :  { %v85_v42 = vmul.f32 0.0078125, %v66_v41 }
  0x9d   :  { %v1830_v43 = vsub.f32 %v1711_v12, %v87_v11  ;;  %v1842_v12 = vsub.f32 %v1713_v13, %v86_v46 }
  0x9e   :  { %v1833_v44 = vsub.f32 %v1715_v14, %v85_v42 }
  0x9f   :  { %v119_v50 = vmul.f32 %v1830_v43, %v1830_v43  ;;  %v118_v57 = vmul.f32 %v1842_v12, %v1842_v12 }
  0xa0   :  { %v117_v10 = vmul.f32 %v1833_v44, %v1833_v44 }
  0xa1   :  { %149 = vadd.xlane.f32.xlu0 %v119_v50 }
  0xa2   :  { %141 = vadd.xlane.f32.xlu2 %v115_v45  ;;  %145 = vadd.xlane.f32.xlu1 %v117_v10  ;;  %v395_v51 = vpop.xlane.xlu2 %394  ;;  %v399_v52 = vpop.xlane.xlu1 %398 }
  0xa3   :  { %v426_v14 = vmul.f32 0.0078125, %v395_v51  ;;  %v72_v53 = vpop.xlane.xlu0 %71  ;;  %v428_v59 = vmul.f32 0.0078125, %v399_v52 }
  0xa4   :  { %v88_v54 = vmul.f32 0.0078125, %v72_v53 }
  0xa5   :  { %v1845_v55 = vsub.f32 %v1720_v15, %v426_v14  ;;  %v1857_v15 = vsub.f32 %v1722_v16, %v428_v59 }
  0xa6   :  { %v1848_v56 = vsub.f32 %v1724_v17, %v88_v54 }
  0xa7   :  { %v458_v62 = vmul.f32 %v1845_v55, %v1845_v55  ;;  %v460_v6 = vmul.f32 %v1857_v15, %v1857_v15 }
  0xa8   :  { %v120_v13 = vmul.f32 %v1848_v56, %v1848_v56 }
  0xa9   :  { %474 = vadd.xlane.f32.xlu0 %v458_v62 }
  0xaa   :  { %147 = vadd.xlane.f32.xlu2 %v118_v57  ;;  %151 = vadd.xlane.f32.xlu1 %v120_v13  ;;  %v401_v63 = vpop.xlane.xlu2 %400  ;;  %v405_v1 = vpop.xlane.xlu1 %404 }
  0xab   :  { %v429_v17 = vmul.f32 0.0078125, %v401_v63  ;;  %v397_v2 = vpop.xlane.xlu0 %396  ;;  %v431_v8 = vmul.f32 0.0078125, %v405_v1 }
  0xac   :  { %v427_v0 = vmul.f32 0.0078125, %v397_v2 }
  0xad   :  { %v1860_v4 = vsub.f32 %v1729_v18, %v429_v17  ;;  %v1872_v18 = vsub.f32 %v1731_v19, %v431_v8 }
  0xae   :  { %v1863_v5 = vsub.f32 %v1733_v20, %v427_v0 }
  0xaf   :  { %v461_v34 = vmul.f32 %v1860_v4, %v1860_v4  ;;  %v463_v41 = vmul.f32 %v1872_v18, %v1872_v18 }
  0xb0   :  { %v459_v16 = vmul.f32 %v1863_v5, %v1863_v5 }
  0xb1   :  { %480 = vadd.xlane.f32.xlu0 %v461_v34 }
  0xb2   :  { %478 = vadd.xlane.f32.xlu2 %v460_v6  ;;  %476 = vadd.xlane.f32.xlu1 %v459_v16  ;;  %v407_v35 = vpop.xlane.xlu2 %406  ;;  %v411_v36 = vpop.xlane.xlu1 %410 }
  0xb3   :  { %v432_v20 = vmul.f32 0.0078125, %v407_v35  ;;  %v403_v7 = vpop.xlane.xlu0 %402  ;;  %v434_v42 = vmul.f32 0.0078125, %v411_v36 }
  0xb4   :  { %v430_v39 = vmul.f32 0.0078125, %v403_v7 }
  0xb5   :  { %v1875_v40 = vsub.f32 %v1738_v21, %v432_v20  ;;  %v1887_v21 = vsub.f32 %v1740_v22, %v434_v42  ;;  %v736_v42 = vld [vmem:[#allocation2 + $0x120] sm:$0xff] }
  0xb6   :  { %v1878_v11 = vsub.f32 %v1742_v23, %v430_v39 }
  0xb7   :  { %v464_v45 = vmul.f32 %v1875_v40, %v1875_v40  ;;  %v466_v53 = vmul.f32 %v1887_v21, %v1887_v21 }
  0xb8   :  { %v462_v19 = vmul.f32 %v1878_v11, %v1878_v11 }
  0xb9   :  { %486 = vadd.xlane.f32.xlu0 %v464_v45  ;;  %v735_v45 = vld [vmem:[#allocation2 + $0x118] sm:$0xff] }
  0xba   :  { %484 = vadd.xlane.f32.xlu2 %v463_v41  ;;  %482 = vadd.xlane.f32.xlu1 %v462_v19  ;;  %v413_v46 = vpop.xlane.xlu2 %412  ;;  %v417_v50 = vpop.xlane.xlu1 %416  ;;  %v1933_v41 = vld [vmem:[#allocation2 + $0x108] sm:$0xff]  ;;  %v740_v19 = vld [vmem:[#allocation2 + $0x140] sm:$0xff] }
  0xbb   :  { %v435_v23 = vmul.f32 0.0078125, %v413_v46  ;;  %v409_v10 = vpop.xlane.xlu0 %408  ;;  %v437_v54 = vmul.f32 0.0078125, %v417_v50  ;;  %v739_v46 = vld [vmem:[#allocation2 + $0x138] sm:$0xff]  ;;  %v738_v50 = vld [vmem:[#allocation2 + $0x130] sm:$0xff] }
  0xbc   :  { %v433_v51 = vmul.f32 0.0078125, %v409_v10  ;;  %v741_v10 = vld [vmem:[#allocation2 + $0x148] sm:$0xff] }
  0xbd   :  { %v1890_v52 = vsub.f32 %v1747_v24, %v435_v23  ;;  %v1902_v24 = vsub.f32 %v1749_v25, %v437_v54  ;;  %v742_v23 = vld [vmem:[#allocation2 + $0x150] sm:$0xff] }
  0xbe   :  { %v1893_v14 = vsub.f32 %v1751_v26, %v433_v51 }
  0xbf   :  { %v467_v57 = vmul.f32 %v1890_v52, %v1890_v52  ;;  %v469_v2 = vmul.f32 %v1902_v24, %v1902_v24 }
  0xc0   :  { %v465_v22 = vmul.f32 %v1893_v14, %v1893_v14 }
  0xc1   :  { %492 = vadd.xlane.f32.xlu0 %v467_v57 }
  0xc2   :  { %490 = vadd.xlane.f32.xlu2 %v466_v53  ;;  %488 = vadd.xlane.f32.xlu1 %v465_v22  ;;  %v419_v59 = vpop.xlane.xlu2 %418  ;;  %v423_v13 = vpop.xlane.xlu1 %422 }
  0xc3   :  { %v438_v62 = vmul.f32 0.0078125, %v419_v59  ;;  %v415_v26 = vpop.xlane.xlu0 %414  ;;  %v440_v0 = vmul.f32 0.0078125, %v423_v13 }
  0xc4   :  { %v436_v63 = vmul.f32 0.0078125, %v415_v26 }
  0xc5   :  { %v1905_v1 = vsub.f32 %v1756_v27, %v438_v62  ;;  %v1917_v27 = vsub.f32 %v1758_v28, %v440_v0  ;;  %v1931_v28 = vld [vmem:[#allocation2 + $0x110] sm:$0xff] }
  0xc6   :  { %v1908_v17 = vsub.f32 %v1760_v29, %v436_v63 }
  0xc7   :  { %v470_v6 = vmul.f32 %v1905_v1, %v1905_v1  ;;  %v472_v20 = vmul.f32 %v1917_v27, %v1917_v27 }
  0xc8   :  { %v468_v25 = vmul.f32 %v1908_v17, %v1908_v17 }
  0xc9   :  { %498 = vadd.xlane.f32.xlu0 %v470_v6 }
  0xca   :  { %496 = vadd.xlane.f32.xlu2 %v469_v2  ;;  %494 = vadd.xlane.f32.xlu1 %v468_v25  ;;  %v425_v8 = vpop.xlane.xlu2 %424 }
  0xcb   :  { %v441_v34 = vmul.f32 0.0078125, %v425_v8  ;;  %v421_v29 = vpop.xlane.xlu0 %420 }
  0xcc   :  { %v439_v16 = vmul.f32 0.0078125, %v421_v29 }
  0xcd   :  { %v1920_v35 = vsub.f32 %v1765_v30, %v441_v34  ;;  %v1935_v30 = vld [vmem:[#allocation2 + $0x100] sm:$0xff] }
  0xce   :  { %v1923_v36 = vsub.f32 %v1767_v31, %v439_v16  ;;  %v737_v31 = vld [vmem:[#allocation2 + $0x128] sm:$0xff] }
  0xcf   :  { %v473_v7 = vmul.f32 %v1920_v35, %v1920_v35 }
  0xd0   :  { %v471_v39 = vmul.f32 %v1923_v36, %v1923_v36 }
  0xd1   :  { %504 = vadd.xlane.f32.xlu0 %v473_v7 }
  0xd2   :  { %502 = vadd.xlane.f32.xlu2 %v472_v20  ;;  %500 = vadd.xlane.f32.xlu1 %v471_v39 }
  0xd9   :  { %752 = vadd.xlane.f32.xlu0 %v1931_v28 }
  0xda   :  { %750 = vadd.xlane.f32.xlu2 %v1933_v41  ;;  %748 = vadd.xlane.f32.xlu1 %v1935_v30 }
  0xe1   :  { %758 = vadd.xlane.f32.xlu0 %v737_v31 }
  0xe2   :  { %756 = vadd.xlane.f32.xlu2 %v736_v42  ;;  %754 = vadd.xlane.f32.xlu1 %v735_v45 }
  0xe9   :  { %764 = vadd.xlane.f32.xlu0 %v740_v19 }
  0xea   :  { %762 = vadd.xlane.f32.xlu2 %v739_v46  ;;  %760 = vadd.xlane.f32.xlu1 %v738_v50 }
  0xf2   :  { %768 = vadd.xlane.f32.xlu2 %v742_v23  ;;  %766 = vadd.xlane.f32.xlu1 %v741_v10 }
  0xf4   :  { %v126_v51 = vpop.xlane.xlu0 %125 }
  0xf5   :  { %v122_v53 = vpop.xlane.xlu1 %121  ;;  %v155_v54 = vmul.f32 0.0078125, %v126_v51 }
  0xf6   :  { %v153_v57 = vmul.f32 0.0078125, %v122_v53 }
  0xf7   :  { %v171_v22 = vadd.f32 1e-05, %v155_v54 }
  0xf8   :  { %v169_v59 = vadd.f32 1e-05, %v153_v57 }
  0xf9   :  { %1462 = vrsqrt.f32 %v171_v22  ;;  %vm211_vm2 = vweird.f32 %v171_v22 }
  0xfa   :  { %1464 = vrsqrt.f32 %v169_v59  ;;  %vm191_vm3 = vweird.f32 %v169_v59 }
  0xfc   :  { %v132_v62 = vpop.xlane.xlu0 %131 }
  0xfd   :  { %v128_v26 = vpop.xlane.xlu1 %127  ;;  %v124_v13 = vpop.xlane.xlu2 %123  ;;  %v158_v63 = vmul.f32 0.0078125, %v132_v62 }
  0xfe   :  { %v156_v2 = vmul.f32 0.0078125, %v128_v26  ;;  %v154_v0 = vmul.f32 0.0078125, %v124_v13 }
  0xff   :  { %v1463_v6 = vpop.eup %1462  ;;  %v1940_v25 = vadd.f32 1e-05, %v158_v63 }
 0x100   :  { %v1465_v8 = vpop.eup %1464  ;;  %v206_v34 = vmul.f32 %v1463_v6, %v171_v22  ;;  %v1942_v29 = vadd.f32 1e-05, %v156_v2  ;;  %v1944_v16 = vadd.f32 1e-05, %v154_v0  ;;  %vm212_vm0 = vweird.f32 %v1463_v6 }
 0x101   :  { %v186_v20 = vmul.f32 %v1465_v8, %v169_v59  ;;  %1466 = vrsqrt.f32 %v1940_v25  ;;  %vm192_vm1 = vweird.f32 %v1465_v8  ;;  %vm213_vm4 = vmor %vm211_vm2, %vm212_vm0  ;;  %vm241_vm6 = vweird.f32 %v1940_v25 }
 0x102   :  { %v207_v7 = vmul.f32 %v1463_v6, %v206_v34  ;;  %1468 = vrsqrt.f32 %v1942_v29  ;;  %vm193_vm5 = vmor %vm191_vm3, %vm192_vm1  ;;  %vm221_vm10 = vweird.f32 %v1942_v29  ;;  %vm201_vm11 = vweird.f32 %v1944_v16 }
 0x103   :  { %v187_v39 = vmul.f32 %v1465_v8, %v186_v20  ;;  %1470 = vrsqrt.f32 %v1944_v16 }
 0x104   :  { %v208_v31 = vmul.f32 0.5, %v207_v7  ;;  %v138_v42 = vpop.xlane.xlu0 %137 }
 0x105   :  { %v188_v45 = vmul.f32 0.5, %v187_v39  ;;  %v130_v19 = vpop.xlane.xlu2 %129  ;;  %v134_v46 = vpop.xlane.xlu1 %133  ;;  %v161_v51 = vmul.f32 0.0078125, %v138_v42  ;;  %v745_v42 = vld [vmem:[#allocation2 + $0x168] sm:$0xff] }
 0x106   :  { %v209_v50 = vsub.f32 1.5, %v208_v31  ;;  %v157_v23 = vmul.f32 0.0078125, %v130_v19  ;;  %v159_v10 = vmul.f32 0.0078125, %v134_v46  ;;  %v743_v31 = vld [vmem:[#allocation2 + $0x158] sm:$0xff]  ;;  %774 = vadd.xlane.f32.xlu2 %v745_v42  ;;  %v744_v46 = vld [vmem:[#allocation2 + $0x160] sm:$0xff] }
 0x107   :  { %v1949_v53 = vpop.eup %1466  ;;  %v189_v54 = vsub.f32 1.5, %v188_v45  ;;  %v1967_v39 = vadd.f32 1e-05, %v161_v51  ;;  %770 = vadd.xlane.f32.xlu0 %v743_v31  ;;  %772 = vadd.xlane.f32.xlu1 %v744_v46 }
 0x108   :  { %v1951_v57 = vpop.eup %1468  ;;  %v210_v62 = vmul.f32 %v1463_v6, %v209_v50  ;;  %v236_v26 = vmul.f32 %v1949_v53, %v1940_v25  ;;  %v1955_v13 = vadd.f32 1e-05, %v157_v23  ;;  %v1962_v34 = vadd.f32 1e-05, %v159_v10 }
 0x109   :  { %v1957_v63 = vpop.eup %1470  ;;  %v190_v2 = vmul.f32 %v1465_v8, %v189_v54  ;;  %v216_v0 = vmul.f32 %v1951_v57, %v1942_v29  ;;  %vm242_vm7 = vweird.f32 %v1949_v53  ;;  %vm222_vm8 = vweird.f32 %v1951_v57 }
 0x10a   :  { %v214_v20 = vsel %vm213_vm4, %v1463_v6, %v210_v62  ;;  %v196_v22 = vmul.f32 %v1957_v63, %v1944_v16  ;;  %v237_v7 = vmul.f32 %v1949_v53, %v236_v26  ;;  %1472 = vrsqrt.f32 %v1955_v13  ;;  %vm243_vm12 = vmor %vm241_vm6, %vm242_vm7 }
 0x10b   :  { %v194_v45 = vsel %vm193_vm5, %v1465_v8, %v190_v2  ;;  %v347_v59 = vmul.f32 %v214_v20, %v1772_v37  ;;  %v217_v19 = vmul.f32 %v1951_v57, %v216_v0  ;;  %1474 = vrsqrt.f32 %v1962_v34  ;;  %vm223_vm13 = vmor %vm221_vm10, %vm222_vm8 }
 0x10c   :  { %v345_v6 = vmul.f32 %v194_v45, %v1775_v38  ;;  %v197_v50 = vmul.f32 %v1957_v63, %v196_v22  ;;  %v238_v23 = vmul.f32 0.5, %v237_v7  ;;  %v144_v10 = vpop.xlane.xlu0 %143  ;;  %1476 = vrsqrt.f32 %v1967_v39 }
 0x10d   :  { %363 = vst [vmem:[#allocation5 + $0x10] sm:$0xff] %v347_v59  ;;  %v218_v51 = vmul.f32 0.5, %v217_v19  ;;  %v136_v37 = vpop.xlane.xlu2 %135  ;;  %v140_v8 = vpop.xlane.xlu1 %139  ;;  %v164_v0 = vmul.f32 0.0078125, %v144_v10  ;;  %vm202_vm9 = vweird.f32 %v1957_v63  ;;  %vm231_vm15 = vweird.f32 %v1955_v13 }
 0x10e   :  { %361 = vst [vmem:[#allocation5] sm:$0xff] %v345_v6  ;;  %v198_v54 = vmul.f32 0.5, %v197_v50  ;;  %v239_v62 = vsub.f32 1.5, %v238_v23  ;;  %v160_v38 = vmul.f32 0.0078125, %v136_v37  ;;  %v162_v2 = vmul.f32 0.0078125, %v140_v8  ;;  %vm203_vm14 = vmor %vm201_vm11, %vm202_vm9  ;;  %v746_v37 = vld [vmem:[#allocation2 + $0x170] sm:$0xff] }
 0x10f   :  { %v219_v26 = vsub.f32 1.5, %v218_v51  ;;  %v2005_v16 = vadd.f32 1e-05, %v164_v0  ;;  %v747_v8 = vld [vmem:[#allocation2 + $0x178] sm:$0xff]  ;;  %776 = vadd.xlane.f32.xlu0 %v746_v37  ;;  %vm251_vm1 = vweird.f32 %v1962_v34  ;;  %vm271_vm5 = vweird.f32 %v1967_v39 }
 0x110   :  { %v199_v20 = vsub.f32 1.5, %v198_v54  ;;  %v240_v22 = vmul.f32 %v1949_v53, %v239_v62  ;;  %v1981_v7 = vadd.f32 1e-05, %v160_v38  ;;  %v1983_v31 = vpop.eup %1472  ;;  %v1996_v46 = vadd.f32 1e-05, %v162_v2  ;;  %778 = vadd.xlane.f32.xlu1 %v747_v8 }
 0x111   :  { %v220_v42 = vmul.f32 %v1951_v57, %v219_v26  ;;  %v226_v19 = vmul.f32 %v1983_v31, %v1955_v13  ;;  %v1998_v6 = vpop.eup %1474  ;;  %vm232_vm0 = vweird.f32 %v1983_v31 }
 0x112   :  { %v200_v45 = vmul.f32 %v1957_v63, %v199_v20  ;;  %v244_v59 = vsel %vm243_vm12, %v1949_v53, %v240_v22  ;;  %1478 = vrsqrt.f32 %v1981_v7  ;;  %v2007_v50 = vpop.eup %1476  ;;  %vm252_vm2 = vweird.f32 %v1998_v6  ;;  %vm233_vm3 = vmor %vm231_vm15, %vm232_vm0 }
 0x113   :  { %v224_v29 = vsel %vm223_vm13, %v1951_v57, %v220_v42  ;;  %v350_v25 = vmul.f32 %v244_v59, %v1782_v47  ;;  %v227_v10 = vmul.f32 %v1983_v31, %v226_v19  ;;  %v246_v57 = vmul.f32 %v1998_v6, %v1962_v34  ;;  %vm253_vm6 = vmor %vm251_vm1, %vm252_vm2 }
 0x114   :  { %v348_v53 = vmul.f32 %v224_v29, %v1785_v48  ;;  %v204_v23 = vsel %vm203_vm14, %v1957_v63, %v200_v45  ;;  %v150_v51 = vpop.xlane.xlu0 %149  ;;  %v266_v54 = vmul.f32 %v2007_v50, %v1967_v39  ;;  %1480 = vrsqrt.f32 %v1996_v46 }
 0x115   :  { %v346_v47 = vmul.f32 %v204_v23, %v1788_v49  ;;  %366 = vst [vmem:[#allocation5 + $0x28] sm:$0xff] %v350_v25  ;;  %v142_v62 = vpop.xlane.xlu2 %141  ;;  %v146_v38 = vpop.xlane.xlu1 %145  ;;  %v228_v48 = vmul.f32 0.5, %v227_v10  ;;  %v247_v63 = vmul.f32 %v1998_v6, %v246_v57  ;;  %1482 = vrsqrt.f32 %v2005_v16 }
 0x116   :  { %364 = vst [vmem:[#allocation5 + $0x18] sm:$0xff] %v348_v53  ;;  %v267_v26 = vmul.f32 %v2007_v50, %v266_v54  ;;  %v163_v49 = vmul.f32 0.0078125, %v142_v62  ;;  %v165_v20 = vmul.f32 0.0078125, %v146_v38  ;;  %v167_v59 = vmul.f32 0.0078125, %v150_v51 }
 0x117   :  { %362 = vst [vmem:[#allocation5 + $0x8] sm:$0xff] %v346_v47  ;;  %v229_v2 = vsub.f32 1.5, %v228_v48  ;;  %v248_v0 = vmul.f32 0.5, %v247_v63  ;;  %vm272_vm4 = vweird.f32 %v2007_v50  ;;  %vm261_vm8 = vweird.f32 %v1981_v7 }
 0x118   :  { %v2023_v22 = vpop.eup %1478  ;;  %v268_v42 = vmul.f32 0.5, %v267_v26  ;;  %v2026_v45 = vadd.f32 1e-05, %v163_v49  ;;  %v2036_v23 = vadd.f32 1e-05, %v165_v20  ;;  %vm273_vm7 = vmor %vm271_vm5, %vm272_vm4  ;;  %vm281_vm10 = vweird.f32 %v1996_v46 }
 0x119   :  { %v230_v19 = vmul.f32 %v1983_v31, %v229_v2  ;;  %v249_v29 = vsub.f32 1.5, %v248_v0  ;;  %v256_v25 = vmul.f32 %v2023_v22, %v1981_v7  ;;  %v2054_v62 = vadd.f32 1e-05, %v167_v59 }
 0x11a   :  { %v269_v53 = vsub.f32 1.5, %v268_v42  ;;  %1484 = vrsqrt.f32 %v2026_v45  ;;  %v2038_v10 = vpop.eup %1480  ;;  %vm262_vm9 = vweird.f32 %v2023_v22  ;;  %vm301_vm14 = vweird.f32 %v2005_v16 }
 0x11b   :  { %v234_v57 = vsel %vm233_vm3, %v1983_v31, %v230_v19  ;;  %v250_v51 = vmul.f32 %v1998_v6, %v249_v29  ;;  %v257_v37 = vmul.f32 %v2023_v22, %v256_v25  ;;  %v2044_v13 = vpop.eup %1482  ;;  %v276_v31 = vmul.f32 %v2038_v10, %v1996_v46  ;;  %vm263_vm12 = vmor %vm261_vm8, %vm262_vm9 }
 0x11c   :  { %v475_v8 = vpop.xlane.xlu0 %474  ;;  %v349_v47 = vmul.f32 %v234_v57, %v1797_v58  ;;  %v270_v54 = vmul.f32 %v2007_v50, %v269_v53  ;;  %v296_v34 = vmul.f32 %v2044_v13, %v2005_v16  ;;  %1486 = vrsqrt.f32 %v2036_v23 }
 0x11d   :  { %v148_v39 = vpop.xlane.xlu2 %147  ;;  %v152_v38 = vpop.xlane.xlu1 %151  ;;  %v254_v48 = vsel %vm253_vm6, %v1998_v6, %v250_v51  ;;  %v258_v58 = vmul.f32 0.5, %v257_v37  ;;  %v277_v49 = vmul.f32 %v2038_v10, %v276_v31  ;;  %1488 = vrsqrt.f32 %v2054_v62 }
 0x11e   :  { %365 = vst [vmem:[#allocation5 + $0x20] sm:$0xff] %v349_v47  ;;  %v351_v63 = vmul.f32 %v254_v48, %v1803_v61  ;;  %v274_v26 = vsel %vm273_vm7, %v2007_v50, %v270_v54  ;;  %v297_v0 = vmul.f32 %v2044_v13, %v296_v34  ;;  %v166_v61 = vmul.f32 0.0078125, %v148_v39 }
 0x11f   :  { %v353_v6 = vmul.f32 %v274_v26, %v1800_v60  ;;  %v259_v2 = vsub.f32 1.5, %v258_v58  ;;  %v278_v42 = vmul.f32 0.5, %v277_v49  ;;  %vm282_vm11 = vweird.f32 %v2038_v10 }
 0x120   :  { %v2069_v20 = vpop.eup %1484  ;;  %367 = vst [vmem:[#allocation5 + $0x30] sm:$0xff] %v351_v63  ;;  %v298_v60 = vmul.f32 0.5, %v297_v0  ;;  %v2079_v29 = vadd.f32 1e-05, %v166_v61  ;;  %v168_v25 = vmul.f32 0.0078125, %v152_v38  ;;  %v506_v53 = vmul.f32 0.0078125, %v475_v8  ;;  %vm283_vm15 = vmor %vm281_vm10, %vm282_vm11 }
 0x121   :  { %369 = vst [vmem:[#allocation5 + $0x40] sm:$0xff] %v353_v6  ;;  %v260_v50 = vmul.f32 %v2023_v22, %v259_v2  ;;  %v286_v59 = vmul.f32 %v2069_v20, %v2026_v45  ;;  %v279_v19 = vsub.f32 1.5, %v278_v42  ;;  %vm302_vm13 = vweird.f32 %v2044_v13 }
 0x122   :  { %v299_v51 = vsub.f32 1.5, %v298_v60  ;;  %v2084_v54 = vpop.eup %1486  ;;  %1490 = vrsqrt.f32 %v2079_v29  ;;  %vm292_vm0 = vweird.f32 %v2069_v20  ;;  %vm303_vm1 = vmor %vm301_vm14, %vm302_vm13  ;;  %v2103_v58 = vadd.f32 1e-05, %v168_v25 }
 0x123   :  { %v264_v57 = vsel %vm263_vm12, %v2023_v22, %v260_v50  ;;  %v287_v37 = vmul.f32 %v2069_v20, %v286_v59  ;;  %v280_v7 = vmul.f32 %v2038_v10, %v279_v19  ;;  %v2098_v48 = vpop.eup %1488  ;;  %v2105_v46 = vadd.f32 1e-05, %v506_v53 }
 0x124   :  { %v481_v47 = vpop.xlane.xlu0 %480  ;;  %v352_v31 = vmul.f32 %v264_v57, %v1812_v3  ;;  %v300_v22 = vmul.f32 %v2044_v13, %v299_v51  ;;  %v306_v3 = vmul.f32 %v2084_v54, %v2036_v23  ;;  %1492 = vrsqrt.f32 %v2103_v58 }
 0x125   :  { %v479_v39 = vpop.xlane.xlu2 %478  ;;  %v477_v8 = vpop.xlane.xlu1 %476  ;;  %v288_v38 = vmul.f32 0.5, %v287_v37  ;;  %v284_v16 = vsel %vm283_vm15, %v2038_v10, %v280_v7  ;;  %v326_v10 = vmul.f32 %v2098_v48, %v2054_v62  ;;  %vm291_vm2 = vweird.f32 %v2026_v45 }
 0x126   :  { %368 = vst [vmem:[#allocation5 + $0x38] sm:$0xff] %v352_v31  ;;  %v508_v34 = vmul.f32 0.0078125, %v479_v39  ;;  %v354_v63 = vmul.f32 %v284_v16, %v1818_v33  ;;  %v304_v26 = vsel %vm303_vm1, %v2044_v13, %v300_v22  ;;  %v307_v6 = vmul.f32 %v2084_v54, %v306_v3  ;;  %vm293_vm3 = vmor %vm291_vm2, %vm292_vm0 }
 0x127   :  { %v289_v49 = vsub.f32 1.5, %v288_v38  ;;  %v356_v2 = vmul.f32 %v304_v26, %v1815_v32  ;;  %1494 = vrsqrt.f32 %v2105_v46  ;;  %vm311_vm4 = vweird.f32 %v2036_v23 }
 0x128   :  { %370 = vst [vmem:[#allocation5 + $0x48] sm:$0xff] %v354_v63  ;;  %v308_v42 = vmul.f32 0.5, %v307_v6  ;;  %v2117_v33 = vpop.eup %1490  ;;  %v327_v32 = vmul.f32 %v2098_v48, %v326_v10  ;;  %v2123_v13 = vadd.f32 1e-05, %v508_v34  ;;  %v507_v61 = vmul.f32 0.0078125, %v477_v8 }
 0x129   :  { %v290_v0 = vmul.f32 %v2069_v20, %v289_v49  ;;  %372 = vst [vmem:[#allocation5 + $0x58] sm:$0xff] %v356_v2  ;;  %vm312_vm5 = vweird.f32 %v2084_v54  ;;  %v316_v45 = vmul.f32 %v2117_v33, %v2079_v29  ;;  %vm331_vm6 = vweird.f32 %v2054_v62 }
 0x12a   :  { %v309_v60 = vsub.f32 1.5, %v308_v42  ;;  %v328_v25 = vmul.f32 0.5, %v327_v32  ;;  %1496 = vrsqrt.f32 %v2123_v13  ;;  %vm321_vm7 = vweird.f32 %v2079_v29  ;;  %v2137_v31 = vpop.eup %1492  ;;  %vm313_vm8 = vmor %vm311_vm4, %vm312_vm5 }
 0x12b   :  { %v294_v50 = vsel %vm293_vm3, %v2069_v20, %v290_v0  ;;  %v317_v20 = vmul.f32 %v2117_v33, %v316_v45  ;;  %v2135_v37 = vadd.f32 1e-05, %v507_v61  ;;  %vm332_vm9 = vweird.f32 %v2098_v48 }
 0x12c   :  { %v487_v59 = vpop.xlane.xlu0 %486  ;;  %v355_v19 = vmul.f32 %v294_v50, %v1827_v9  ;;  %v310_v51 = vmul.f32 %v2084_v54, %v309_v60  ;;  %v329_v9 = vsub.f32 1.5, %v328_v25  ;;  %v509_v7 = vmul.f32 0.0078125, %v481_v47  ;;  %vm333_vm12 = vmor %vm331_vm6, %vm332_vm9 }
 0x12d   :  { %v485_v53 = vpop.xlane.xlu2 %484  ;;  %v483_v57 = vpop.xlane.xlu1 %482  ;;  %v318_v38 = vmul.f32 0.5, %v317_v20  ;;  %vm322_vm10 = vweird.f32 %v2117_v33  ;;  %v336_v3 = vmul.f32 %v2137_v31, %v2103_v58  ;;  %vm341_vm11 = vweird.f32 %v2103_v58 }
 0x12e   :  { %371 = vst [vmem:[#allocation5 + $0x50] sm:$0xff] %v355_v19  ;;  %v511_v39 = vmul.f32 0.0078125, %v485_v53  ;;  %v2144_v8 = vpop.eup %1494  ;;  %v314_v22 = vsel %vm313_vm8, %v2084_v54, %v310_v51  ;;  %v330_v16 = vmul.f32 %v2098_v48, %v329_v9  ;;  %v510_v34 = vmul.f32 0.0078125, %v483_v57  ;;  %vm323_vm13 = vmor %vm321_vm7, %vm322_vm10 }
 0x12f   :  { %v357_v23 = vmul.f32 %v314_v22, %v1833_v44  ;;  %v539_v47 = vmul.f32 %v2144_v8, %v2105_v46  ;;  %v319_v54 = vsub.f32 1.5, %v318_v38  ;;  %v337_v63 = vmul.f32 %v2137_v31, %v336_v3 }
 0x130   :  { %1498 = vrsqrt.f32 %v2135_v37  ;;  %v512_v26 = vmul.f32 0.0078125, %v487_v59  ;;  %v2159_v49 = vpop.eup %1496  ;;  %v334_v44 = vsel %vm333_vm12, %v2098_v48, %v330_v16  ;;  %v2163_v2 = vadd.f32 1e-05, %v509_v7 }
 0x131   :  { %373 = vst [vmem:[#allocation5 + $0x60] sm:$0xff] %v357_v23  ;;  %v540_v6 = vmul.f32 %v2144_v8, %v539_v47  ;;  %v2165_v10 = vadd.f32 1e-05, %v511_v39  ;;  %v359_v62 = vmul.f32 %v334_v44, %v1830_v43  ;;  %v320_v0 = vmul.f32 %v2117_v33, %v319_v54 }
 0x132   :  { %v338_v42 = vmul.f32 0.5, %v337_v63  ;;  %v559_v32 = vmul.f32 %v2159_v49, %v2123_v13  ;;  %vm342_vm14 = vweird.f32 %v2137_v31  ;;  %vm544_vm15 = vweird.f32 %v2105_v46 }
 0x133   :  { %v541_v48 = vmul.f32 0.5, %v540_v6  ;;  %1500 = vrsqrt.f32 %v2163_v2  ;;  %375 = vst [vmem:[#allocation5 + $0x70] sm:$0xff] %v359_v62  ;;  %v324_v60 = vsel %vm323_vm13, %v2117_v33, %v320_v0  ;;  %vm545_vm0 = vweird.f32 %v2144_v8  ;;  %vm343_vm2 = vmor %vm341_vm11, %vm342_vm14 }
 0x134   :  { %v493_v61 = vpop.xlane.xlu0 %492  ;;  %v339_v45 = vsub.f32 1.5, %v338_v42  ;;  %v560_v59 = vmul.f32 %v2159_v49, %v559_v32  ;;  %1502 = vrsqrt.f32 %v2165_v10  ;;  %v358_v29 = vmul.f32 %v324_v60, %v1842_v12  ;;  %vm546_vm3 = vmor %vm544_vm15, %vm545_vm0 }
 0x135   :  { %v491_v43 = vpop.xlane.xlu2 %490  ;;  %v489_v50 = vpop.xlane.xlu1 %488  ;;  %v542_v19 = vsub.f32 1.5, %v541_v48  ;;  %v2183_v25 = vadd.f32 1e-05, %v510_v34  ;;  %vm564_vm1 = vweird.f32 %v2123_v13  ;;  %v2189_v33 = vadd.f32 1e-05, %v512_v26 }
 0x136   :  { %v2185_v53 = vpop.eup %1498  ;;  %v340_v57 = vmul.f32 %v2137_v31, %v339_v45  ;;  %v561_v51 = vmul.f32 0.5, %v560_v59  ;;  %374 = vst [vmem:[#allocation5 + $0x68] sm:$0xff] %v358_v29  ;;  %v514_v9 = vmul.f32 0.0078125, %v491_v43  ;;  %vm565_vm4 = vweird.f32 %v2159_v49 }
 0x137   :  { %v543_v12 = vmul.f32 %v2144_v8, %v542_v19  ;;  %v549_v20 = vmul.f32 %v2185_v53, %v2135_v37  ;;  %1504 = vrsqrt.f32 %v2183_v25  ;;  %vm554_vm5 = vweird.f32 %v2135_v37  ;;  %vm566_vm7 = vmor %vm564_vm1, %vm565_vm4 }
 0x138   :  { %v344_v7 = vsel %vm343_vm2, %v2137_v31, %v340_v57  ;;  %v562_v39 = vsub.f32 1.5, %v561_v51  ;;  %1506 = vrsqrt.f32 %v2189_v33  ;;  %vm574_vm6 = vweird.f32 %v2163_v2 }
 0x139   :  { %v2204_v58 = vpop.eup %1500  ;;  %v360_v22 = vmul.f32 %v344_v7, %v1848_v56  ;;  %v547_v38 = vsel %vm546_vm3, %v2144_v8, %v543_v12  ;;  %v550_v3 = vmul.f32 %v2185_v53, %v549_v20  ;;  %vm555_vm8 = vweird.f32 %v2185_v53 }
 0x13a   :  { %v2210_v23 = vpop.eup %1502  ;;  %v698_v46 = vmul.f32 %v547_v38, %v1845_v55  ;;  %v563_v31 = vmul.f32 %v2159_v49, %v562_v39  ;;  %v569_v16 = vmul.f32 %v2204_v58, %v2163_v2  ;;  %v2224_v55 = vadd.f32 1e-05, %v514_v9  ;;  %vm556_vm12 = vmor %vm554_vm5, %vm555_vm8 }
 0x13b   :  { %376 = vst [vmem:[#allocation5 + $0x78] sm:$0xff] %v360_v22  ;;  %v551_v56 = vmul.f32 0.5, %v550_v3  ;;  %v589_v8 = vmul.f32 %v2210_v23, %v2165_v10  ;;  %v513_v44 = vmul.f32 0.0078125, %v489_v50  ;;  %v515_v6 = vmul.f32 0.0078125, %v493_v61 }
 0x13c   :  { %v2217_v47 = vpop.xlane.xlu0 %498  ;;  %715 = vst [vmem:[#allocation5 + $0x80] sm:$0xff] %v698_v46  ;;  %v567_v63 = vsel %vm566_vm7, %v2159_v49, %v563_v31  ;;  %v570_v26 = vmul.f32 %v2204_v58, %v569_v16  ;;  %1508 = vrsqrt.f32 %v2224_v55  ;;  %vm575_vm9 = vweird.f32 %v2204_v58 }
 0x13d   :  { %v497_v34 = vpop.xlane.xlu2 %496  ;;  %v495_v54 = vpop.xlane.xlu1 %494  ;;  %v700_v13 = vmul.f32 %v567_v63, %v1857_v15  ;;  %v552_v0 = vsub.f32 1.5, %v551_v56  ;;  %v590_v42 = vmul.f32 %v2210_v23, %v589_v8  ;;  %vm594_vm10 = vweird.f32 %v2165_v10  ;;  %vm576_vm13 = vmor %vm574_vm6, %vm575_vm9 }
 0x13e   :  { %v2228_v62 = vpop.eup %1504  ;;  %v571_v48 = vmul.f32 0.5, %v570_v26  ;;  %vm595_vm11 = vweird.f32 %v2210_v23  ;;  %v2248_v45 = vadd.f32 1e-05, %v513_v44  ;;  %v2250_v59 = vadd.f32 1e-05, %v515_v6 }
 0x13f   :  { %v2233_v32 = vpop.eup %1506  ;;  %v579_v49 = vmul.f32 %v2228_v62, %v2183_v25  ;;  %717 = vst [vmem:[#allocation5 + $0x90] sm:$0xff] %v700_v13  ;;  %v553_v61 = vmul.f32 %v2185_v53, %v552_v0  ;;  %v591_v43 = vmul.f32 0.5, %v590_v42  ;;  %v517_v51 = vmul.f32 0.0078125, %v497_v34  ;;  %vm596_vm15 = vmor %vm594_vm10, %vm595_vm11 }
 0x140   :  { %v599_v15 = vmul.f32 %v2233_v32, %v2189_v33  ;;  %v572_v50 = vsub.f32 1.5, %v571_v48  ;;  %1510 = vrsqrt.f32 %v2248_v45  ;;  %vm584_vm14 = vweird.f32 %v2183_v25 }
 0x141   :  { %v580_v60 = vmul.f32 %v2228_v62, %v579_v49  ;;  %v557_v29 = vsel %vm556_vm12, %v2185_v53, %v553_v61  ;;  %v592_v19 = vsub.f32 1.5, %v591_v43  ;;  %1512 = vrsqrt.f32 %v2250_v59 }
 0x142   :  { %v600_v57 = vmul.f32 %v2233_v32, %v599_v15  ;;  %v699_v12 = vmul.f32 %v557_v29, %v1863_v5  ;;  %v573_v20 = vmul.f32 %v2204_v58, %v572_v50  ;;  %v2257_v7 = vpop.eup %1508  ;;  %vm585_vm0 = vweird.f32 %v2228_v62 }
 0x143   :  { %v581_v9 = vmul.f32 0.5, %v580_v60  ;;  %v593_v53 = vmul.f32 %v2210_v23, %v592_v19  ;;  %v619_v2 = vmul.f32 %v2257_v7, %v2224_v55  ;;  %vm605_vm1 = vweird.f32 %v2233_v32  ;;  %vm586_vm2 = vmor %vm584_vm14, %vm585_vm0 }
 0x144   :  { %v505_v37 = vpop.xlane.xlu0 %504  ;;  %v601_v39 = vmul.f32 0.5, %v600_v57  ;;  %716 = vst [vmem:[#allocation5 + $0x88] sm:$0xff] %v699_v12  ;;  %v577_v38 = vsel %vm576_vm13, %v2204_v58, %v573_v20  ;;  %v2280_v8 = vadd.f32 1e-05, %v517_v51  ;;  %vm604_vm3 = vweird.f32 %v2189_v33 }
 0x145   :  { %v503_v5 = vpop.xlane.xlu2 %502  ;;  %v501_v22 = vpop.xlane.xlu1 %500  ;;  %v582_v3 = vsub.f32 1.5, %v581_v9  ;;  %v701_v46 = vmul.f32 %v577_v38, %v1860_v4  ;;  %v597_v31 = vsel %vm596_vm15, %v2210_v23, %v593_v53  ;;  %v620_v10 = vmul.f32 %v2257_v7, %v619_v2  ;;  %vm606_vm4 = vmor %vm604_vm3, %vm605_vm1 }
 0x146   :  { %v602_v16 = vsub.f32 1.5, %v601_v39  ;;  %v703_v58 = vmul.f32 %v597_v31, %v1872_v18  ;;  %v516_v4 = vmul.f32 0.0078125, %v495_v54  ;;  %v518_v23 = vmul.f32 0.0078125, %v2217_v47  ;;  %v2287_v63 = vpop.eup %1510 }
 0x147   :  { %v583_v56 = vmul.f32 %v2228_v62, %v582_v3  ;;  %718 = vst [vmem:[#allocation5 + $0x98] sm:$0xff] %v701_v46  ;;  %v621_v26 = vmul.f32 0.5, %v620_v10  ;;  %1514 = vrsqrt.f32 %v2280_v8  ;;  %v520_v44 = vmul.f32 0.0078125, %v503_v5  ;;  %v2291_v6 = vpop.eup %1512 }
 0x148   :  { %v603_v34 = vmul.f32 %v2233_v32, %v602_v16  ;;  %720 = vst [vmem:[#allocation5 + $0xa8] sm:$0xff] %v703_v58  ;;  %vm624_vm5 = vweird.f32 %v2224_v55  ;;  %v609_v33 = vmul.f32 %v2287_v63, %v2248_v45  ;;  %vm625_vm6 = vweird.f32 %v2257_v7 }
 0x149   :  { %v587_v18 = vsel %vm586_vm2, %v2228_v62, %v583_v56  ;;  %v622_v54 = vsub.f32 1.5, %v621_v26  ;;  %v629_v62 = vmul.f32 %v2291_v6, %v2250_v59  ;;  %v2303_v42 = vadd.f32 1e-05, %v516_v4  ;;  %vm626_vm7 = vmor %vm624_vm5, %vm625_vm6 }
 0x14a   :  { %v702_v25 = vmul.f32 %v587_v18, %v1878_v11  ;;  %v607_v13 = vsel %vm606_vm4, %v2233_v32, %v603_v34  ;;  %v610_v0 = vmul.f32 %v2287_v63, %v609_v33  ;;  %v2305_v11 = vadd.f32 1e-05, %v518_v23 }
 0x14b   :  { %v704_v47 = vmul.f32 %v607_v13, %v1875_v40  ;;  %v519_v32 = vmul.f32 0.0078125, %v501_v22  ;;  %v623_v61 = vmul.f32 %v2257_v7, %v622_v54  ;;  %v630_v40 = vmul.f32 %v2291_v6, %v629_v62 }
 0x14c   :  { %719 = vst [vmem:[#allocation5 + $0xa0] sm:$0xff] %v702_v25  ;;  %v2309_v43 = vadd.f32 1e-05, %v520_v44  ;;  %v521_v15 = vmul.f32 0.0078125, %v505_v37  ;;  %v753_v50 = vpop.xlane.xlu0 %752  ;;  %v611_v60 = vmul.f32 0.5, %v610_v0  ;;  %vm614_vm8 = vweird.f32 %v2248_v45 }
 0x14d   :  { %v751_v48 = vpop.xlane.xlu2 %750  ;;  %v749_v49 = vpop.xlane.xlu1 %748  ;;  %721 = vst [vmem:[#allocation5 + $0xb0] sm:$0xff] %v704_v47  ;;  %vm634_vm9 = vweird.f32 %v2250_v59  ;;  %1516 = vrsqrt.f32 %v2303_v42  ;;  %v627_v19 = vsel %vm626_vm7, %v2257_v7, %v623_v61  ;;  %vm615_vm10 = vweird.f32 %v2287_v63 }
 0x14e   :  { %v2318_v29 = vpop.eup %1514  ;;  %v631_v57 = vmul.f32 0.5, %v630_v40  ;;  %1518 = vrsqrt.f32 %v2305_v11  ;;  %v706_v51 = vmul.f32 %v627_v19, %v1887_v21  ;;  %v612_v55 = vsub.f32 1.5, %v611_v60  ;;  %vm616_vm13 = vmor %vm614_vm8, %vm615_vm10  ;;  %v1590_v19 = vld [vmem:[#allocation2 + $0x120] sm:$0xff] }
 0x14f   :  { %vm635_vm11 = vweird.f32 %v2291_v6  ;;  %v649_v12 = vmul.f32 %v2318_v29, %v2280_v8  ;;  %1520 = vrsqrt.f32 %v2309_v43  ;;  %v2328_v9 = vadd.f32 1e-05, %v519_v32 }
 0x150   :  { %v632_v20 = vsub.f32 1.5, %v631_v57  ;;  %v2330_v37 = vadd.f32 1e-05, %v521_v15  ;;  %723 = vst [vmem:[#allocation5 + $0xc0] sm:$0xff] %v706_v51  ;;  %v613_v7 = vmul.f32 %v2287_v63, %v612_v55  ;;  %vm654_vm12 = vweird.f32 %v2280_v8  ;;  %vm636_vm15 = vmor %vm634_vm9, %vm635_vm11 }
 0x151   :  { %v650_v53 = vmul.f32 %v2318_v29, %v649_v12  ;;  %v781_v21 = vmul.f32 0.0078125, %v751_v48  ;;  %vm655_vm14 = vweird.f32 %v2318_v29  ;;  %1522 = vrsqrt.f32 %v2328_v9 }
 0x152   :  { %v633_v39 = vmul.f32 %v2291_v6, %v632_v20  ;;  %v780_v5 = vmul.f32 0.0078125, %v749_v49  ;;  %v617_v38 = vsel %vm616_vm13, %v2287_v63, %v613_v7  ;;  %1524 = vrsqrt.f32 %v2330_v37  ;;  %vm656_vm6 = vmor %vm654_vm12, %vm655_vm14 }
 0x153   :  { %v2342_v22 = vpop.eup %1516  ;;  %v651_v3 = vmul.f32 0.5, %v650_v53  ;;  %v2351_v45 = vsub.f32 %v1933_v41, %v781_v21  ;;  %v705_v16 = vmul.f32 %v617_v38, %v1893_v14  ;;  %vm644_vm0 = vweird.f32 %v2303_v42 }
 0x154   :  { %v2353_v31 = vpop.eup %1518  ;;  %v637_v58 = vsel %vm636_vm15, %v2291_v6, %v633_v39  ;;  %v639_v56 = vmul.f32 %v2342_v22, %v2303_v42  ;;  %vm645_vm1 = vweird.f32 %v2342_v22  ;;  %vm664_vm2 = vweird.f32 %v2305_v11  ;;  %v759_v63 = vpop.xlane.xlu0 %758 }
 0x155   :  { %v757_v2 = vpop.xlane.xlu2 %756  ;;  %v755_v46 = vpop.xlane.xlu1 %754  ;;  %v707_v59 = vmul.f32 %v637_v58, %v1890_v52  ;;  %v652_v10 = vsub.f32 1.5, %v651_v3  ;;  %v659_v41 = vmul.f32 %v2353_v31, %v2305_v11  ;;  %vm665_vm3 = vweird.f32 %v2353_v31  ;;  %722 = vst [vmem:[#allocation5 + $0xb8] sm:$0xff] %v705_v16  ;;  %vm646_vm11 = vmor %vm644_vm0, %vm645_vm1  ;;  %v1592_v16 = vld [vmem:[#allocation2 + $0x128] sm:$0xff] }
 0x156   :  { %v2366_v14 = vpop.eup %1520  ;;  %v640_v34 = vmul.f32 %v2342_v22, %v639_v56  ;;  %v2370_v4 = vsub.f32 %v1935_v30, %v780_v5  ;;  %v782_v23 = vmul.f32 0.0078125, %v753_v50  ;;  %v813_v52 = vmul.f32 %v2351_v45, %v2351_v45  ;;  %vm666_vm12 = vmor %vm664_vm2, %vm665_vm3 }
 0x157   :  { %724 = vst [vmem:[#allocation5 + $0xc8] sm:$0xff] %v707_v59  ;;  %v653_v18 = vmul.f32 %v2318_v29, %v652_v10  ;;  %v660_v26 = vmul.f32 %v2353_v31, %v659_v41  ;;  %v679_v44 = vmul.f32 %v2366_v14, %v2309_v43  ;;  %vm684_vm4 = vweird.f32 %v2309_v43  ;;  %v2380_v6 = vpop.eup %1522 }
 0x158   :  { %vm685_vm5 = vweird.f32 %v2366_v14  ;;  %v641_v30 = vmul.f32 0.5, %v640_v34  ;;  %v2387_v25 = vsub.f32 %v1931_v28, %v782_v23  ;;  %830 = vadd.xlane.f32.xlu0 %v813_v52  ;;  %v812_v13 = vmul.f32 %v2370_v4, %v2370_v4  ;;  %v2391_v47 = vpop.eup %1524 }
 0x159   :  { %v784_v33 = vmul.f32 0.0078125, %v757_v2  ;;  %v657_v54 = vsel %vm656_vm6, %v2318_v29, %v653_v18  ;;  %v661_v62 = vmul.f32 0.5, %v660_v26  ;;  %v680_v0 = vmul.f32 %v2366_v14, %v679_v44  ;;  %vm686_vm13 = vmor %vm684_vm4, %vm685_vm5  ;;  %v1591_v2 = vld [vmem:[#allocation2 + $0x118] sm:$0xff]  ;;  %v1594_v26 = vld [vmem:[#allocation2 + $0x130] sm:$0xff] }
 0x15a   :  { %v669_v8 = vmul.f32 %v2380_v6, %v2328_v9  ;;  %vm674_vm7 = vweird.f32 %v2328_v9  ;;  %v709_v28 = vmul.f32 %v657_v54, %v1902_v24  ;;  %v642_v32 = vsub.f32 1.5, %v641_v30  ;;  %828 = vadd.xlane.f32.xlu2 %v812_v13 }
 0x15b   :  { %vm675_vm8 = vweird.f32 %v2380_v6  ;;  %v689_v48 = vmul.f32 %v2391_v47, %v2330_v37  ;;  %vm694_vm9 = vweird.f32 %v2330_v37  ;;  %v662_v49 = vsub.f32 1.5, %v661_v62 }
 0x15c   :  { %v681_v61 = vmul.f32 0.5, %v680_v0  ;;  %v670_v40 = vmul.f32 %v2380_v6, %v669_v8  ;;  %vm695_vm10 = vweird.f32 %v2391_v47  ;;  %726 = vst [vmem:[#allocation5 + $0xd8] sm:$0xff] %v709_v28  ;;  %v643_v24 = vmul.f32 %v2342_v22, %v642_v32  ;;  %vm676_vm14 = vmor %vm674_vm7, %vm675_vm8  ;;  %v1597_v8 = vld [vmem:[#allocation2 + $0x148] sm:$0xff] }
 0x15d   :  { %v763_v15 = vpop.xlane.xlu2 %762  ;;  %v761_v50 = vpop.xlane.xlu1 %760  ;;  %v690_v60 = vmul.f32 %v2391_v47, %v689_v48  ;;  %v814_v29 = vmul.f32 %v2387_v25, %v2387_v25  ;;  %v2409_v57 = vsub.f32 %v1590_v19, %v784_v33  ;;  %v663_v51 = vmul.f32 %v2353_v31, %v662_v49  ;;  %vm696_vm15 = vmor %vm694_vm9, %vm695_vm10  ;;  %v1595_v33 = vld [vmem:[#allocation2 + $0x140] sm:$0xff]  ;;  %v2499_v19 = vld [vmem:[#allocation2 + $0x1b8] sm:$0xff] }
 0x15e   :  { %v682_v55 = vsub.f32 1.5, %v681_v61  ;;  %v671_v12 = vmul.f32 0.5, %v670_v40  ;;  %v783_v20 = vmul.f32 0.0078125, %v755_v46  ;;  %v647_v7 = vsel %vm646_vm11, %v2342_v22, %v643_v24  ;;  %v2475_v49 = vld [vmem:[#allocation2 + $0x180] sm:$0xff]  ;;  %v2477_v61 = vld [vmem:[#allocation2 + $0x190] sm:$0xff]  ;;  %v2481_v40 = vld [vmem:[#allocation2 + $0x188] sm:$0xff] }
 0x15f   :  { %v691_v53 = vmul.f32 0.5, %v690_v60  ;;  %832 = vadd.xlane.f32.xlu1 %v814_v29  ;;  %v785_v21 = vmul.f32 0.0078125, %v759_v63  ;;  %v816_v39 = vmul.f32 %v2409_v57, %v2409_v57  ;;  %v708_v42 = vmul.f32 %v647_v7, %v1908_v17  ;;  %v765_v17 = vpop.xlane.xlu0 %764  ;;  %v2490_v24 = vld [vmem:[#allocation2 + $0x1a0] sm:$0xff]  ;;  %v2492_v60 = vld [vmem:[#allocation2 + $0x1b0] sm:$0xff] }
 0x160   :  { %v667_v5 = vsel %vm666_vm12, %v2353_v31, %v663_v51  ;;  %v683_v38 = vmul.f32 %v2366_v14, %v682_v55  ;;  %v672_v3 = vsub.f32 1.5, %v671_v12  ;;  %v2431_v46 = vsub.f32 %v1591_v2, %v783_v20  ;;  %v2495_v29 = vld [vmem:[#allocation2 + $0x1c0] sm:$0xff]  ;;  %v2501_v51 = vld [vmem:[#allocation2 + $0x1c8] sm:$0xff]  ;;  %v2504_v55 = vld [vmem:[#allocation2 + $0x1d8] sm:$0xff] }
 0x161   :  { %v710_v22 = vmul.f32 %v667_v5, %v1905_v1  ;;  %v692_v11 = vsub.f32 1.5, %v691_v53  ;;  %v2433_v58 = vsub.f32 %v1592_v16, %v785_v21  ;;  %836 = vadd.xlane.f32.xlu0 %v816_v39  ;;  %725 = vst [vmem:[#allocation5 + $0xd0] sm:$0xff] %v708_v42  ;;  %v787_v1 = vmul.f32 0.0078125, %v763_v15  ;;  %v2483_v15 = vld [vmem:[#allocation2 + $0x198] sm:$0xff]  ;;  %v2508_v20 = vld [vmem:[#allocation2 + $0x1d0] sm:$0xff]  ;;  %v2510_v7 = vld [vmem:[#allocation2 + $0x1e0] sm:$0xff] }
 0x162   :  { %v687_v31 = vsel %vm686_vm13, %v2366_v14, %v683_v38  ;;  %v673_v56 = vmul.f32 %v2380_v6, %v672_v3  ;;  %v786_v59 = vmul.f32 0.0078125, %v761_v50  ;;  %v815_v41 = vmul.f32 %v2431_v46, %v2431_v46  ;;  %v2486_v50 = vld [vmem:[#allocation2 + $0x1a8] sm:$0xff]  ;;  %v2513_v39 = vld [vmem:[#allocation2 + $0x1f0] sm:$0xff]  ;;  %v1598_v5 = vld [vmem:[#allocation2 + $0x160] sm:$0xff] }
 0x163   :  { %727 = vst [vmem:[#allocation5 + $0xe0] sm:$0xff] %v710_v22  ;;  %v712_v43 = vmul.f32 %v687_v31, %v1917_v27  ;;  %v693_v10 = vmul.f32 %v2391_v47, %v692_v11  ;;  %v817_v14 = vmul.f32 %v2433_v58, %v2433_v58  ;;  %v1593_v27 = vld [vmem:[#allocation2 + $0x138] sm:$0xff]  ;;  %v788_v9 = vmul.f32 0.0078125, %v765_v17  ;;  %v2519_v22 = vld [vmem:[#allocation2 + $0x1e8] sm:$0xff] }
 0x164   :  { %v677_v34 = vsel %vm676_vm14, %v2380_v6, %v673_v56  ;;  %v2452_v23 = vsub.f32 %v1593_v27, %v787_v1  ;;  %834 = vadd.xlane.f32.xlu2 %v815_v41  ;;  %v2456_v44 = vsub.f32 %v1594_v26, %v786_v59  ;;  %v2521_v16 = vld [vmem:[#allocation2 + $0x1f8] sm:$0xff] }
 0x165   :  { %v769_v52 = vpop.xlane.xlu2 %768  ;;  %729 = vst [vmem:[#allocation5 + $0xf0] sm:$0xff] %v712_v43  ;;  %v711_v63 = vmul.f32 %v677_v34, %v1923_v36  ;;  %v697_v18 = vsel %vm696_vm15, %v2391_v47, %v693_v10  ;;  %v767_v13 = vpop.xlane.xlu1 %766  ;;  %v2461_v54 = vsub.f32 %v1595_v33, %v788_v9  ;;  %v1596_v47 = vld [vmem:[#allocation2 + $0x150] sm:$0xff]  ;;  %v1599_v17 = vld [vmem:[#allocation2 + $0x158] sm:$0xff]  ;;  %v1600_v43 = vld [vmem:[#allocation2 + $0x168] sm:$0xff] }
 0x166   :  { %v790_v6 = vmul.f32 0.0078125, %v769_v52  ;;  %v713_v30 = vmul.f32 %v697_v18, %v1920_v35  ;;  %v819_v37 = vmul.f32 %v2452_v23, %v2452_v23  ;;  %v818_v36 = vmul.f32 %v2456_v44, %v2456_v44  ;;  %v1602_v52 = vld [vmem:[#allocation2 + $0x170] sm:$0xff] }
 0x167   :  { %728 = vst [vmem:[#allocation5 + $0xe8] sm:$0xff] %v711_v63  ;;  %838 = vadd.xlane.f32.xlu1 %v817_v14  ;;  %v789_v0 = vmul.f32 0.0078125, %v767_v13  ;;  %v820_v35 = vmul.f32 %v2461_v54, %v2461_v54  ;;  %v1601_v14 = vld [vmem:[#allocation2 + $0x178] sm:$0xff] }
 0x168   :  { %730 = vst [vmem:[#allocation5 + $0xf8] sm:$0xff] %v713_v30  ;;  %v2465_v62 = vsub.f32 %v1596_v47, %v790_v6 }
 0x169   :  { %842 = vadd.xlane.f32.xlu0 %v819_v37  ;;  %v2469_v28 = vsub.f32 %v1597_v8, %v789_v0 }
 0x16a   :  { %v822_v32 = vmul.f32 %v2465_v62, %v2465_v62 }
 0x16b   :  { %v821_v48 = vmul.f32 %v2469_v28, %v2469_v28 }
 0x16c   :  { %840 = vadd.xlane.f32.xlu2 %v818_v36 }
 0x16f   :  { %844 = vadd.xlane.f32.xlu1 %v820_v35 }
 0x171   :  { %848 = vadd.xlane.f32.xlu0 %v822_v32 }
 0x174   :  { %846 = vadd.xlane.f32.xlu2 %v821_v48 }
 0x177   :  { %1102 = vadd.xlane.f32.xlu1 %v2475_v49 }
 0x179   :  { %1106 = vadd.xlane.f32.xlu0 %v2477_v61  ;;  %v775_v42 = vpop.xlane.xlu2 %774 }
 0x17a   :  { %v773_v12 = vpop.xlane.xlu1 %772  ;;  %v771_v53 = vpop.xlane.xlu0 %770  ;;  %v793_v2 = vmul.f32 0.0078125, %v775_v42 }
 0x17b   :  { %v792_v21 = vmul.f32 0.0078125, %v773_v12  ;;  %v791_v3 = vmul.f32 0.0078125, %v771_v53 }
 0x17c   :  { %1104 = vadd.xlane.f32.xlu2 %v2481_v40  ;;  %v2529_v10 = vsub.f32 %v1600_v43, %v793_v2 }
 0x17d   :  { %v2517_v38 = vsub.f32 %v1598_v5, %v792_v21  ;;  %v2524_v31 = vsub.f32 %v1599_v17, %v791_v3 }
 0x17e   :  { %v825_v9 = vmul.f32 %v2529_v10, %v2529_v10 }
 0x17f   :  { %1108 = vadd.xlane.f32.xlu1 %v2483_v15  ;;  %v824_v56 = vmul.f32 %v2517_v38, %v2517_v38  ;;  %v823_v41 = vmul.f32 %v2524_v31, %v2524_v31 }
 0x181   :  { %1112 = vadd.xlane.f32.xlu0 %v2486_v50 }
 0x182   :  { %v777_v59 = vpop.xlane.xlu0 %776 }
 0x183   :  { %v779_v11 = vpop.xlane.xlu1 %778  ;;  %v794_v27 = vmul.f32 0.0078125, %v777_v59 }
 0x184   :  { %1110 = vadd.xlane.f32.xlu2 %v2490_v24  ;;  %v795_v1 = vmul.f32 0.0078125, %v779_v11 }
 0x185   :  { %v2537_v63 = vsub.f32 %v1602_v52, %v794_v27 }
 0x186   :  { %v2533_v34 = vsub.f32 %v1601_v14, %v795_v1 }
 0x187   :  { %1114 = vadd.xlane.f32.xlu1 %v2492_v60  ;;  %v826_v26 = vmul.f32 %v2537_v63, %v2537_v63 }
 0x188   :  { %v827_v18 = vmul.f32 %v2533_v34, %v2533_v34 }
 0x189   :  { %1118 = vadd.xlane.f32.xlu0 %v2495_v29 }
 0x18c   :  { %1116 = vadd.xlane.f32.xlu2 %v2499_v19 }
 0x18f   :  { %1120 = vadd.xlane.f32.xlu1 %v2501_v51 }
 0x191   :  { %1124 = vadd.xlane.f32.xlu0 %v2504_v55 }
 0x194   :  { %1122 = vadd.xlane.f32.xlu2 %v2508_v20 }
 0x197   :  { %1126 = vadd.xlane.f32.xlu1 %v2510_v7 }
 0x199   :  { %1130 = vadd.xlane.f32.xlu0 %v2513_v39 }
 0x19c   :  { %1128 = vadd.xlane.f32.xlu2 %v2519_v22 }
 0x19f   :  { %1132 = vadd.xlane.f32.xlu1 %v2521_v16 }
 0x1a1   :  { %852 = vadd.xlane.f32.xlu0 %v824_v56 }
 0x1a4   :  { %850 = vadd.xlane.f32.xlu2 %v823_v41 }
 0x1a7   :  { %854 = vadd.xlane.f32.xlu1 %v825_v9 }
 0x1a9   :  { %858 = vadd.xlane.f32.xlu0 %v827_v18 }
 0x1ac   :  { %856 = vadd.xlane.f32.xlu2 %v826_v26 }
 0x1cb   :  { %v831_v6 = vpop.xlane.xlu0 %830 }
 0x1cc   :  { %v861_v30 = vmul.f32 0.0078125, %v831_v6 }
 0x1cd   :  { %v829_v37 = vpop.xlane.xlu2 %828 }
 0x1ce   :  { %v860_v13 = vmul.f32 0.0078125, %v829_v37  ;;  %v877_v33 = vadd.f32 1e-05, %v861_v30 }
 0x1d0   :  { %v876_v36 = vadd.f32 1e-05, %v860_v13  ;;  %1526 = vrsqrt.f32 %v877_v33  ;;  %vm908_vm2 = vweird.f32 %v877_v33 }
 0x1d2   :  { %v833_v47 = vpop.xlane.xlu1 %832  ;;  %1528 = vrsqrt.f32 %v876_v36  ;;  %vm898_vm3 = vweird.f32 %v876_v36 }
 0x1d3   :  { %v862_v0 = vmul.f32 0.0078125, %v833_v47 }
 0x1d4   :  { %v837_v35 = vpop.xlane.xlu0 %836 }
 0x1d5   :  { %v2543_v8 = vadd.f32 1e-05, %v862_v0  ;;  %v864_v32 = vmul.f32 0.0078125, %v837_v35 }
 0x1d6   :  { %v1527_v48 = vpop.eup %1526 }
 0x1d7   :  { %1530 = vrsqrt.f32 %v2543_v8  ;;  %v2546_v12 = vadd.f32 1e-05, %v864_v32  ;;  %v903_v53 = vmul.f32 %v1527_v48, %v877_v33  ;;  %v835_v21 = vpop.xlane.xlu2 %834  ;;  %vm909_vm0 = vweird.f32 %v1527_v48 }
 0x1d8   :  { %v1529_v42 = vpop.eup %1528  ;;  %v863_v5 = vmul.f32 0.0078125, %v835_v21  ;;  %vm910_vm4 = vmor %vm908_vm2, %vm909_vm0  ;;  %vm918_vm6 = vweird.f32 %v2543_v8 }
 0x1d9   :  { %1532 = vrsqrt.f32 %v2546_v12  ;;  %v893_v3 = vmul.f32 %v1529_v42, %v876_v36  ;;  %v904_v11 = vmul.f32 %v1527_v48, %v903_v53  ;;  %vm899_vm1 = vweird.f32 %v1529_v42 }
 0x1da   :  { %v839_v2 = vpop.xlane.xlu1 %838  ;;  %v2549_v17 = vadd.f32 1e-05, %v863_v5  ;;  %vm900_vm5 = vmor %vm898_vm3, %vm899_vm1  ;;  %vm938_vm8 = vweird.f32 %v2546_v12 }
 0x1db   :  { %v865_v56 = vmul.f32 0.0078125, %v839_v2  ;;  %v894_v1 = vmul.f32 %v1529_v42, %v893_v3  ;;  %v905_v59 = vmul.f32 0.5, %v904_v11 }
 0x1dc   :  { %v843_v43 = vpop.xlane.xlu0 %842  ;;  %1534 = vrsqrt.f32 %v2549_v17  ;;  %vm928_vm9 = vweird.f32 %v2549_v17 }
 0x1dd   :  { %v1531_v41 = vpop.eup %1530  ;;  %v2552_v14 = vadd.f32 1e-05, %v865_v56  ;;  %v867_v27 = vmul.f32 0.0078125, %v843_v43  ;;  %v895_v9 = vmul.f32 0.5, %v894_v1  ;;  %v906_v18 = vsub.f32 1.5, %v905_v59 }
 0x1de   :  { %v913_v52 = vmul.f32 %v1531_v41, %v2543_v8  ;;  %vm919_vm7 = vweird.f32 %v1531_v41 }
 0x1df   :  { %v2555_v26 = vpop.eup %1532  ;;  %1536 = vrsqrt.f32 %v2552_v14  ;;  %v2558_v6 = vadd.f32 1e-05, %v867_v27  ;;  %v896_v30 = vsub.f32 1.5, %v895_v9  ;;  %v907_v13 = vmul.f32 %v1527_v48, %v906_v18  ;;  %v841_v0 = vpop.xlane.xlu2 %840  ;;  %vm920_vm10 = vmor %vm918_vm6, %vm919_vm7 }
 0x1e0   :  { %v914_v37 = vmul.f32 %v1531_v41, %v913_v52  ;;  %v933_v47 = vmul.f32 %v2555_v26, %v2546_v12  ;;  %v866_v35 = vmul.f32 0.0078125, %v841_v0  ;;  %vm939_vm11 = vweird.f32 %v2555_v26 }
 0x1e1   :  { %1538 = vrsqrt.f32 %v2558_v6  ;;  %v897_v32 = vmul.f32 %v1529_v42, %v896_v30  ;;  %v911_v21 = vsel %vm910_vm4, %v1527_v48, %v907_v13  ;;  %vm940_vm14 = vmor %vm938_vm8, %vm939_vm11  ;;  %vm948_vm0 = vweird.f32 %v2552_v14 }
 0x1e2   :  { %v915_v53 = vmul.f32 0.5, %v914_v37  ;;  %v934_v33 = vmul.f32 %v2555_v26, %v933_v47  ;;  %v845_v5 = vpop.xlane.xlu1 %844  ;;  %v2564_v3 = vpop.eup %1534  ;;  %v1053_v11 = vmul.f32 %v911_v21, %v2351_v45  ;;  %v2569_v2 = vadd.f32 1e-05, %v866_v35 }
 0x1e3   :  { %v868_v36 = vmul.f32 0.0078125, %v845_v5  ;;  %v901_v56 = vsel %vm900_vm5, %v1529_v42, %v897_v32  ;;  %v923_v48 = vmul.f32 %v2564_v3, %v2549_v17  ;;  %vm929_vm12 = vweird.f32 %v2564_v3 }
 0x1e4   :  { %v916_v1 = vsub.f32 1.5, %v915_v53  ;;  %v849_v59 = vpop.xlane.xlu0 %848  ;;  %v1052_v27 = vmul.f32 %v901_v56, %v2370_v4  ;;  %1070 = vst [vmem:[#allocation5 + $0x108] sm:$0xff] %v1053_v11  ;;  %v935_v9 = vmul.f32 0.5, %v934_v33  ;;  %1540 = vrsqrt.f32 %v2569_v2  ;;  %vm930_vm15 = vmor %vm928_vm9, %vm929_vm12 }
 0x1e5   :  { %v2573_v43 = vpop.eup %1536  ;;  %v924_v52 = vmul.f32 %v2564_v3, %v923_v48  ;;  %v2588_v30 = vadd.f32 1e-05, %v868_v36  ;;  %v870_v37 = vmul.f32 0.0078125, %v849_v59  ;;  %vm968_vm3 = vweird.f32 %v2558_v6 }
 0x1e6   :  { %v917_v45 = vmul.f32 %v1531_v41, %v916_v1  ;;  %v943_v42 = vmul.f32 %v2573_v43, %v2552_v14  ;;  %1069 = vst [vmem:[#allocation5 + $0x100] sm:$0xff] %v1052_v27  ;;  %v936_v4 = vsub.f32 1.5, %v935_v9  ;;  %vm949_vm13 = vweird.f32 %v2573_v43 }
 0x1e7   :  { %v2582_v18 = vpop.eup %1538  ;;  %v925_v47 = vmul.f32 0.5, %v924_v52  ;;  %v847_v32 = vpop.xlane.xlu2 %846  ;;  %1542 = vrsqrt.f32 %v2588_v30  ;;  %v2606_v1 = vadd.f32 1e-05, %v870_v37  ;;  %vm950_vm1 = vmor %vm948_vm0, %vm949_vm13  ;;  %vm958_vm6 = vweird.f32 %v2569_v2 }
 0x1e8   :  { %v921_v13 = vsel %vm920_vm10, %v1531_v41, %v917_v45  ;;  %v944_v0 = vmul.f32 %v2573_v43, %v943_v42  ;;  %v963_v35 = vmul.f32 %v2582_v18, %v2558_v6  ;;  %v937_v8 = vmul.f32 %v2555_v26, %v936_v4 }
 0x1e9   :  { %v1054_v53 = vmul.f32 %v921_v13, %v2387_v25  ;;  %v926_v21 = vsub.f32 1.5, %v925_v47  ;;  %v869_v36 = vmul.f32 0.0078125, %v847_v32  ;;  %1544 = vrsqrt.f32 %v2606_v1 }
 0x1ea   :  { %v945_v33 = vmul.f32 0.5, %v944_v0  ;;  %v964_v41 = vmul.f32 %v2582_v18, %v963_v35  ;;  %v1103_v5 = vpop.xlane.xlu1 %1102  ;;  %v2603_v11 = vpop.eup %1540  ;;  %v941_v25 = vsel %vm940_vm14, %v2555_v26, %v937_v8  ;;  %vm969_vm2 = vweird.f32 %v2582_v18 }
 0x1eb   :  { %1071 = vst [vmem:[#allocation5 + $0x110] sm:$0xff] %v1054_v53  ;;  %v1134_v56 = vmul.f32 0.0078125, %v1103_v5  ;;  %v927_v48 = vmul.f32 %v2564_v3, %v926_v21  ;;  %v1056_v27 = vmul.f32 %v941_v25, %v2409_v57  ;;  %v953_v12 = vmul.f32 %v2603_v11, %v2569_v2  ;;  %vm970_vm5 = vmor %vm968_vm3, %vm969_vm2 }
 0x1ec   :  { %v946_v59 = vsub.f32 1.5, %v945_v33  ;;  %v1107_v9 = vpop.xlane.xlu0 %1106  ;;  %v965_v26 = vmul.f32 0.5, %v964_v41  ;;  %v2617_v45 = vadd.f32 1e-05, %v869_v36  ;;  %vm959_vm4 = vweird.f32 %v2603_v11 }
 0x1ed   :  { %v2620_v52 = vsub.f32 %v2475_v49, %v1134_v56  ;;  %v931_v42 = vsel %vm930_vm15, %v2564_v3, %v927_v48  ;;  %1073 = vst [vmem:[#allocation5 + $0x120] sm:$0xff] %v1056_v27  ;;  %v954_v4 = vmul.f32 %v2603_v11, %v953_v12  ;;  %v2626_v37 = vpop.eup %1542  ;;  %v1136_v21 = vmul.f32 0.0078125, %v1107_v9  ;;  %vm960_vm7 = vmor %vm958_vm6, %vm959_vm4 }
 0x1ee   :  { %v947_v57 = vmul.f32 %v2573_v43, %v946_v59  ;;  %v1055_v17 = vmul.f32 %v931_v42, %v2431_v46  ;;  %v966_v14 = vsub.f32 1.5, %v965_v26  ;;  %1546 = vrsqrt.f32 %v2617_v45 }
 0x1ef   :  { %v955_v3 = vmul.f32 0.5, %v954_v4  ;;  %v973_v13 = vmul.f32 %v2626_v37, %v2588_v30  ;;  %v1105_v47 = vpop.xlane.xlu2 %1104  ;;  %v1166_v35 = vmul.f32 %v2620_v52, %v2620_v52  ;;  %v1545_v33 = vpop.eup %1544  ;;  %vm978_vm8 = vweird.f32 %v2588_v30 }
 0x1f0   :  { %v951_v49 = vsel %vm950_vm1, %v2573_v43, %v947_v57  ;;  %1072 = vst [vmem:[#allocation5 + $0x118] sm:$0xff] %v1055_v17  ;;  %v967_v0 = vmul.f32 %v2582_v18, %v966_v14  ;;  %v1135_v53 = vmul.f32 0.0078125, %v1105_v47  ;;  %v993_v2 = vmul.f32 %v1545_v33, %v2606_v1 }
 0x1f1   :  { %v1057_v46 = vmul.f32 %v951_v49, %v2433_v58  ;;  %v956_v32 = vsub.f32 1.5, %v955_v3  ;;  %v974_v43 = vmul.f32 %v2626_v37, %v973_v13  ;;  %1182 = vadd.xlane.f32.xlu1 %v1166_v35  ;;  %v2658_v59 = vsub.f32 %v2477_v61, %v1136_v21 }
 0x1f2   :  { %v1109_v8 = vpop.xlane.xlu1 %1108  ;;  %v971_v6 = vsel %vm970_vm5, %v2582_v18, %v967_v0  ;;  %v2648_v36 = vsub.f32 %v2481_v40, %v1135_v53  ;;  %vm979_vm9 = vweird.f32 %v2626_v37  ;;  %v994_v9 = vmul.f32 %v1545_v33, %v993_v2 }
 0x1f3   :  { %1074 = vst [vmem:[#allocation5 + $0x128] sm:$0xff] %v1057_v46  ;;  %v1137_v58 = vmul.f32 0.0078125, %v1109_v8  ;;  %v957_v41 = vmul.f32 %v2603_v11, %v956_v32  ;;  %v975_v5 = vmul.f32 0.5, %v974_v43  ;;  %v1059_v25 = vmul.f32 %v971_v6, %v2452_v23  ;;  %vm980_vm10 = vmor %vm978_vm8, %vm979_vm9 }
 0x1f4   :  { %v1113_v56 = vpop.xlane.xlu0 %1112  ;;  %v1547_v48 = vpop.eup %1546  ;;  %vm999_vm11 = vweird.f32 %v1545_v33  ;;  %vm998_vm13 = vweird.f32 %v2606_v1  ;;  %vm988_vm14 = vweird.f32 %v2617_v45 }
 0x1f5   :  { %v2655_v18 = vsub.f32 %v2483_v15, %v1137_v58  ;;  %v961_v23 = vsel %vm960_vm7, %v2603_v11, %v957_v41  ;;  %v976_v27 = vsub.f32 1.5, %v975_v5  ;;  %1076 = vst [vmem:[#allocation5 + $0x138] sm:$0xff] %v1059_v25  ;;  %v983_v40 = vmul.f32 %v1547_v48, %v2617_v45  ;;  %vm1000_vm15 = vmor %vm998_vm13, %vm999_vm11 }
 0x1f6   :  { %v1058_v12 = vmul.f32 %v961_v23, %v2456_v44  ;;  %v1167_v15 = vmul.f32 %v2648_v36, %v2648_v36  ;;  %v1168_v11 = vmul.f32 %v2658_v59, %v2658_v59  ;;  %v1139_v4 = vmul.f32 0.0078125, %v1113_v56 }
 0x1f7   :  { %v1169_v26 = vmul.f32 %v2655_v18, %v2655_v18  ;;  %v977_v61 = vmul.f32 %v2626_v37, %v976_v27  ;;  %v984_v42 = vmul.f32 %v1547_v48, %v983_v40  ;;  %v1111_v57 = vpop.xlane.xlu2 %1110  ;;  %v995_v44 = vmul.f32 0.5, %v994_v9 }
 0x1f8   :  { %1075 = vst [vmem:[#allocation5 + $0x130] sm:$0xff] %v1058_v12  ;;  %1184 = vadd.xlane.f32.xlu2 %v1167_v15  ;;  %v1138_v17 = vmul.f32 0.0078125, %v1111_v57  ;;  %1186 = vadd.xlane.f32.xlu0 %v1168_v11  ;;  %v2675_v13 = vsub.f32 %v2486_v50, %v1139_v4  ;;  %vm989_vm12 = vweird.f32 %v1547_v48 }
 0x1f9   :  { %v981_v14 = vsel %vm980_vm10, %v2626_v37, %v977_v61  ;;  %v985_v49 = vmul.f32 0.5, %v984_v42  ;;  %v996_v46 = vsub.f32 1.5, %v995_v44  ;;  %1188 = vadd.xlane.f32.xlu1 %v1169_v26  ;;  %vm990_vm0 = vmor %vm988_vm14, %vm989_vm12 }
 0x1fa   :  { %v1115_v3 = vpop.xlane.xlu1 %1114  ;;  %v1060_v47 = vmul.f32 %v981_v14, %v2461_v54  ;;  %v2679_v0 = vsub.f32 %v2490_v24, %v1138_v17  ;;  %v1171_v24 = vmul.f32 %v2675_v13, %v2675_v13 }
 0x1fb   :  { %v1140_v30 = vmul.f32 0.0078125, %v1115_v3  ;;  %v986_v35 = vsub.f32 1.5, %v985_v49  ;;  %v997_v37 = vmul.f32 %v1545_v33, %v996_v46 }
 0x1fc   :  { %v1119_v32 = vpop.xlane.xlu0 %1118  ;;  %1077 = vst [vmem:[#allocation5 + $0x140] sm:$0xff] %v1060_v47  ;;  %v1170_v50 = vmul.f32 %v2679_v0, %v2679_v0 }
 0x1fd   :  { %v2683_v43 = vsub.f32 %v2492_v60, %v1140_v30  ;;  %v987_v54 = vmul.f32 %v1547_v48, %v986_v35  ;;  %v1142_v53 = vmul.f32 0.0078125, %v1119_v32  ;;  %v1001_v8 = vsel %vm1000_vm15, %v1545_v33, %v997_v37 }
 0x1fe   :  { %v1062_v60 = vmul.f32 %v1001_v8, %v2465_v62 }
 0x1ff   :  { %v1172_v1 = vmul.f32 %v2683_v43, %v2683_v43  ;;  %v991_v21 = vsel %vm990_vm0, %v1547_v48, %v987_v54  ;;  %v1117_v6 = vpop.xlane.xlu2 %1116  ;;  %v2696_v5 = vsub.f32 %v2495_v29, %v1142_v53 }
 0x200   :  { %v1061_v58 = vmul.f32 %v991_v21, %v2469_v28  ;;  %1190 = vadd.xlane.f32.xlu2 %v1170_v50  ;;  %v1141_v41 = vmul.f32 0.0078125, %v1117_v6  ;;  %1079 = vst [vmem:[#allocation5 + $0x150] sm:$0xff] %v1062_v60  ;;  %1192 = vadd.xlane.f32.xlu0 %v1171_v24 }
 0x201   :  { %1194 = vadd.xlane.f32.xlu1 %v1172_v1  ;;  %v1174_v48 = vmul.f32 %v2696_v5, %v2696_v5 }
 0x202   :  { %v1121_v45 = vpop.xlane.xlu1 %1120  ;;  %1078 = vst [vmem:[#allocation5 + $0x148] sm:$0xff] %v1061_v58  ;;  %v2699_v33 = vsub.f32 %v2499_v19, %v1141_v41 }
 0x203   :  { %v1143_v25 = vmul.f32 0.0078125, %v1121_v45 }
 0x204   :  { %v1125_v56 = vpop.xlane.xlu0 %1124  ;;  %v1173_v28 = vmul.f32 %v2699_v33, %v2699_v33 }
 0x205   :  { %v2702_v62 = vsub.f32 %v2501_v51, %v1143_v25  ;;  %v1145_v2 = vmul.f32 0.0078125, %v1125_v56 }
 0x207   :  { %v1175_v29 = vmul.f32 %v2702_v62, %v2702_v62  ;;  %v1123_v23 = vpop.xlane.xlu2 %1122  ;;  %v2711_v40 = vsub.f32 %v2504_v55, %v1145_v2 }
 0x208   :  { %1196 = vadd.xlane.f32.xlu2 %v1173_v28  ;;  %v1144_v27 = vmul.f32 0.0078125, %v1123_v23  ;;  %1198 = vadd.xlane.f32.xlu0 %v1174_v48 }
 0x209   :  { %1200 = vadd.xlane.f32.xlu1 %v1175_v29  ;;  %v1177_v61 = vmul.f32 %v2711_v40, %v2711_v40 }
 0x20a   :  { %v1127_v19 = vpop.xlane.xlu1 %1126  ;;  %v2714_v51 = vsub.f32 %v2508_v20, %v1144_v27 }
 0x20b   :  { %v1146_v12 = vmul.f32 0.0078125, %v1127_v19 }
 0x20c   :  { %v1131_v9 = vpop.xlane.xlu0 %1130  ;;  %v1176_v15 = vmul.f32 %v2714_v51, %v2714_v51 }
 0x20d   :  { %v2717_v26 = vsub.f32 %v2510_v7, %v1146_v12  ;;  %v1148_v42 = vmul.f32 0.0078125, %v1131_v9 }
 0x20f   :  { %v1178_v55 = vmul.f32 %v2717_v26, %v2717_v26  ;;  %v1129_v11 = vpop.xlane.xlu2 %1128  ;;  %v2726_v4 = vsub.f32 %v2513_v39, %v1148_v42 }
 0x210   :  { %1202 = vadd.xlane.f32.xlu2 %v1176_v15  ;;  %v1147_v57 = vmul.f32 0.0078125, %v1129_v11  ;;  %1204 = vadd.xlane.f32.xlu0 %v1177_v61 }
 0x211   :  { %1206 = vadd.xlane.f32.xlu1 %v1178_v55  ;;  %v1180_v47 = vmul.f32 %v2726_v4, %v2726_v4 }
 0x212   :  { %v1133_v20 = vpop.xlane.xlu1 %1132  ;;  %v2729_v7 = vsub.f32 %v2519_v22, %v1147_v57 }
 0x213   :  { %v1149_v44 = vmul.f32 0.0078125, %v1133_v20 }
 0x214   :  { %v853_v17 = vpop.xlane.xlu0 %852  ;;  %v1179_v49 = vmul.f32 %v2729_v7, %v2729_v7 }
 0x215   :  { %v2732_v14 = vsub.f32 %v2521_v16, %v1149_v44  ;;  %v872_v3 = vmul.f32 0.0078125, %v853_v17 }
 0x217   :  { %v1181_v39 = vmul.f32 %v2732_v14, %v2732_v14  ;;  %v888_v46 = vadd.f32 1e-05, %v872_v3  ;;  %v851_v30 = vpop.xlane.xlu2 %850 }
 0x218   :  { %1208 = vadd.xlane.f32.xlu2 %v1179_v49  ;;  %v871_v22 = vmul.f32 0.0078125, %v851_v30  ;;  %1210 = vadd.xlane.f32.xlu0 %v1180_v47 }
 0x219   :  { %1548 = vrsqrt.f32 %v888_v46  ;;  %1212 = vadd.xlane.f32.xlu1 %v1181_v39  ;;  %vm1018_vm1 = vweird.f32 %v888_v46 }
 0x21a   :  { %v855_v35 = vpop.xlane.xlu1 %854  ;;  %v887_v32 = vadd.f32 1e-05, %v871_v22 }
 0x21b   :  { %v873_v16 = vmul.f32 0.0078125, %v855_v35 }
 0x21c   :  { %v859_v37 = vpop.xlane.xlu0 %858  ;;  %1550 = vrsqrt.f32 %v887_v32  ;;  %vm1008_vm3 = vweird.f32 %v887_v32 }
 0x21d   :  { %v889_v50 = vadd.f32 1e-05, %v873_v16  ;;  %v875_v54 = vmul.f32 0.0078125, %v859_v37 }
 0x21f   :  { %v1549_v24 = vpop.eup %1548  ;;  %1552 = vrsqrt.f32 %v889_v50  ;;  %v891_v53 = vadd.f32 1e-05, %v875_v54  ;;  %v857_v1 = vpop.xlane.xlu2 %856  ;;  %vm1028_vm6 = vweird.f32 %v889_v50 }
 0x220   :  { %v1013_v8 = vmul.f32 %v1549_v24, %v888_v46  ;;  %v874_v21 = vmul.f32 0.0078125, %v857_v1  ;;  %vm1019_vm2 = vweird.f32 %v1549_v24 }
 0x221   :  { %1554 = vrsqrt.f32 %v891_v53  ;;  %vm1020_vm5 = vmor %vm1018_vm1, %vm1019_vm2  ;;  %vm1048_vm10 = vweird.f32 %v891_v53 }
 0x222   :  { %v1014_v60 = vmul.f32 %v1549_v24, %v1013_v8  ;;  %v1551_v6 = vpop.eup %1550  ;;  %v890_v58 = vadd.f32 1e-05, %v874_v21 }
 0x223   :  { %v1003_v41 = vmul.f32 %v1551_v6, %v887_v32  ;;  %vm1009_vm4 = vweird.f32 %v1551_v6 }
 0x224   :  { %v1015_v45 = vmul.f32 0.5, %v1014_v60  ;;  %1556 = vrsqrt.f32 %v890_v58  ;;  %vm1010_vm8 = vmor %vm1008_vm3, %vm1009_vm4  ;;  %vm1038_vm12 = vweird.f32 %v890_v58 }
 0x225   :  { %v1553_v25 = vpop.eup %1552  ;;  %v1004_v28 = vmul.f32 %v1551_v6, %v1003_v41 }
 0x226   :  { %v1023_v56 = vmul.f32 %v1553_v25, %v889_v50  ;;  %v1016_v48 = vsub.f32 1.5, %v1015_v45  ;;  %vm1029_vm7 = vweird.f32 %v1553_v25 }
 0x227   :  { %v1555_v2 = vpop.eup %1554  ;;  %v1005_v23 = vmul.f32 0.5, %v1004_v28  ;;  %vm2741_vm9 = vmor %vm1028_vm6, %vm1029_vm7 }
 0x228   :  { %v1024_v29 = vmul.f32 %v1553_v25, %v1023_v56  ;;  %v1017_v27 = vmul.f32 %v1549_v24, %v1016_v48  ;;  %v1043_v19 = vmul.f32 %v1555_v2, %v891_v53  ;;  %vm1049_vm11 = vweird.f32 %v1555_v2 }
 0x229   :  { %v1006_v9 = vsub.f32 1.5, %v1005_v23  ;;  %vm1050_vm14 = vmor %vm1048_vm10, %vm1049_vm11 }
 0x22a   :  { %v1025_v12 = vmul.f32 0.5, %v1024_v29  ;;  %v1021_v15 = vsel %vm1020_vm5, %v1549_v24, %v1017_v27  ;;  %v1044_v61 = vmul.f32 %v1555_v2, %v1043_v19  ;;  %v1557_v42 = vpop.eup %1556 }
 0x22b   :  { %v1064_v55 = vmul.f32 %v1021_v15, %v2517_v38  ;;  %v1007_v57 = vmul.f32 %v1551_v6, %v1006_v9  ;;  %v1033_v20 = vmul.f32 %v1557_v42, %v890_v58  ;;  %vm1039_vm13 = vweird.f32 %v1557_v42 }
 0x22c   :  { %v1026_v11 = vsub.f32 1.5, %v1025_v12  ;;  %v1045_v17 = vmul.f32 0.5, %v1044_v61  ;;  %vm1040_vm15 = vmor %vm1038_vm12, %vm1039_vm13 }
 0x22d   :  { %1081 = vst [vmem:[#allocation5 + $0x160] sm:$0xff] %v1064_v55  ;;  %v1011_v3 = vsel %vm1010_vm8, %v1551_v6, %v1007_v57  ;;  %v1034_v47 = vmul.f32 %v1557_v42, %v1033_v20 }
 0x22e   :  { %v1027_v49 = vmul.f32 %v1553_v25, %v1026_v11  ;;  %v1063_v39 = vmul.f32 %v1011_v3, %v2524_v31  ;;  %v1046_v46 = vsub.f32 1.5, %v1045_v17 }
 0x22f   :  { %v1035_v30 = vmul.f32 0.5, %v1034_v47 }
 0x230   :  { %v1031_v38 = vsel %vm2741_vm9, %v1553_v25, %v1027_v49  ;;  %1080 = vst [vmem:[#allocation5 + $0x158] sm:$0xff] %v1063_v39  ;;  %v1047_v35 = vmul.f32 %v1555_v2, %v1046_v46 }
 0x231   :  { %v1065_v22 = vmul.f32 %v1031_v38, %v2529_v10  ;;  %v1036_v16 = vsub.f32 1.5, %v1035_v30 }
 0x232   :  { %v1051_v32 = vsel %vm1050_vm14, %v1555_v2, %v1047_v35 }
 0x233   :  { %1082 = vst [vmem:[#allocation5 + $0x168] sm:$0xff] %v1065_v22  ;;  %v1037_v37 = vmul.f32 %v1557_v42, %v1036_v16  ;;  %v1067_v50 = vmul.f32 %v1051_v32, %v2533_v34 }
 0x235   :  { %v1041_v31 = vsel %vm1040_vm15, %v1557_v42, %v1037_v37  ;;  %1084 = vst [vmem:[#allocation5 + $0x178] sm:$0xff] %v1067_v50 }
 0x236   :  { %v1066_v54 = vmul.f32 %v1041_v31, %v2537_v63 }
 0x238   :  { %1083 = vst [vmem:[#allocation5 + $0x170] sm:$0xff] %v1066_v54 }
 0x264   :  { %v1183_v24 = vpop.xlane.xlu1 %1182 }
 0x265   :  { %v1214_v53 = vmul.f32 0.0078125, %v1183_v24 }
 0x267   :  { %v1230_v8 = vadd.f32 1e-05, %v1214_v53 }
 0x269   :  { %1558 = vrsqrt.f32 %v1230_v8  ;;  %vm1252_vm1 = vweird.f32 %v1230_v8 }
 0x26b   :  { %v1185_v1 = vpop.xlane.xlu2 %1184  ;;  %v1187_v21 = vpop.xlane.xlu0 %1186 }
 0x26c   :  { %v1215_v10 = vmul.f32 0.0078125, %v1185_v1  ;;  %v1189_v60 = vpop.xlane.xlu1 %1188  ;;  %v1216_v6 = vmul.f32 0.0078125, %v1187_v21 }
 0x26d   :  { %v1217_v58 = vmul.f32 0.0078125, %v1189_v60 }
 0x26e   :  { %v1231_v41 = vadd.f32 1e-05, %v1215_v10  ;;  %v2751_v45 = vadd.f32 1e-05, %v1216_v6 }
 0x26f   :  { %v1559_v25 = vpop.eup %1558  ;;  %v2753_v34 = vadd.f32 1e-05, %v1217_v58 }
 0x270   :  { %1560 = vrsqrt.f32 %v1231_v41  ;;  %v1247_v56 = vmul.f32 %v1559_v25, %v1230_v8  ;;  %vm1253_vm0 = vweird.f32 %v1559_v25  ;;  %vm1262_vm3 = vweird.f32 %v1231_v41 }
 0x271   :  { %1562 = vrsqrt.f32 %v2751_v45  ;;  %vm1254_vm2 = vmor %vm1252_vm1, %vm1253_vm0  ;;  %vm1272_vm5 = vweird.f32 %v2751_v45  ;;  %vm1282_vm8 = vweird.f32 %v2753_v34 }
 0x272   :  { %1564 = vrsqrt.f32 %v2753_v34  ;;  %v1248_v63 = vmul.f32 %v1559_v25, %v1247_v56 }
 0x273   :  { %v1191_v28 = vpop.xlane.xlu2 %1190  ;;  %v1193_v2 = vpop.xlane.xlu0 %1192 }
 0x274   :  { %v1218_v48 = vmul.f32 0.0078125, %v1191_v28  ;;  %v1249_v29 = vmul.f32 0.5, %v1248_v63  ;;  %v1195_v23 = vpop.xlane.xlu1 %1194  ;;  %v1219_v27 = vmul.f32 0.0078125, %v1193_v2 }
 0x275   :  { %v1220_v12 = vmul.f32 0.0078125, %v1195_v23 }
 0x276   :  { %v1561_v19 = vpop.eup %1560  ;;  %v2757_v9 = vadd.f32 1e-05, %v1218_v48  ;;  %v1250_v61 = vsub.f32 1.5, %v1249_v29  ;;  %v2759_v55 = vadd.f32 1e-05, %v1219_v27 }
 0x277   :  { %v1563_v15 = vpop.eup %1562  ;;  %v1257_v42 = vmul.f32 %v1561_v19, %v1231_v41  ;;  %v2762_v20 = vadd.f32 1e-05, %v1220_v12  ;;  %vm1263_vm4 = vweird.f32 %v1561_v19 }
 0x278   :  { %v1565_v11 = vpop.eup %1564  ;;  %v1267_v57 = vmul.f32 %v1563_v15, %v2751_v45  ;;  %1566 = vrsqrt.f32 %v2757_v9  ;;  %v1251_v44 = vmul.f32 %v1559_v25, %v1250_v61  ;;  %vm1273_vm6 = vweird.f32 %v1563_v15  ;;  %vm1264_vm9 = vmor %vm1262_vm3, %vm1263_vm4 }
 0x279   :  { %v1277_v17 = vmul.f32 %v1565_v11, %v2753_v34  ;;  %v1258_v49 = vmul.f32 %v1561_v19, %v1257_v42  ;;  %1568 = vrsqrt.f32 %v2762_v20  ;;  %vm1283_vm7 = vweird.f32 %v1565_v11  ;;  %vm1274_vm10 = vmor %vm1272_vm5, %vm1273_vm6 }
 0x27a   :  { %v1268_v3 = vmul.f32 %v1563_v15, %v1267_v57  ;;  %v1255_v47 = vsel %vm1254_vm2, %v1559_v25, %v1251_v44  ;;  %1570 = vrsqrt.f32 %v2759_v55  ;;  %vm1312_vm11 = vweird.f32 %v2762_v20  ;;  %vm1284_vm12 = vmor %vm1282_vm8, %vm1283_vm7 }
 0x27b   :  { %v1278_v39 = vmul.f32 %v1565_v11, %v1277_v17  ;;  %v1259_v46 = vmul.f32 0.5, %v1258_v49  ;;  %v1197_v38 = vpop.xlane.xlu2 %1196  ;;  %v1406_v30 = vmul.f32 %v1255_v47, %v2620_v52  ;;  %v1199_v16 = vpop.xlane.xlu0 %1198  ;;  %vm1292_vm13 = vweird.f32 %v2757_v9 }
 0x27c   :  { %v1269_v22 = vmul.f32 0.5, %v1268_v3  ;;  %v1221_v35 = vmul.f32 0.0078125, %v1197_v38  ;;  %v1201_v50 = vpop.xlane.xlu1 %1200  ;;  %v1222_v41 = vmul.f32 0.0078125, %v1199_v16  ;;  %vm1302_vm3 = vweird.f32 %v2759_v55 }
 0x27d   :  { %v1279_v32 = vmul.f32 0.5, %v1278_v39  ;;  %v1260_v37 = vsub.f32 1.5, %v1259_v46  ;;  %1423 = vst [vmem:[#allocation5 + $0x180] sm:$0xff] %v1406_v30  ;;  %v1223_v24 = vmul.f32 0.0078125, %v1201_v50 }
 0x27e   :  { %v2770_v31 = vpop.eup %1566  ;;  %v1270_v54 = vsub.f32 1.5, %v1269_v22  ;;  %v2772_v53 = vadd.f32 1e-05, %v1221_v35  ;;  %v2804_v61 = vadd.f32 1e-05, %v1222_v41 }
 0x27f   :  { %v1280_v8 = vsub.f32 1.5, %v1279_v32  ;;  %v1261_v52 = vmul.f32 %v1561_v19, %v1260_v37  ;;  %v1287_v1 = vmul.f32 %v2770_v31, %v2757_v9  ;;  %v2776_v10 = vpop.eup %1568  ;;  %v2781_v60 = vadd.f32 1e-05, %v1223_v24 }
 0x280   :  { %v1271_v21 = vmul.f32 %v1563_v15, %v1270_v54  ;;  %1572 = vrsqrt.f32 %v2772_v53  ;;  %v2784_v6 = vpop.eup %1570  ;;  %v1307_v56 = vmul.f32 %v2776_v10, %v2762_v20  ;;  %vm1293_vm14 = vweird.f32 %v2770_v31 }
 0x281   :  { %v1281_v58 = vmul.f32 %v1565_v11, %v1280_v8  ;;  %v1265_v25 = vsel %vm1264_vm9, %v1561_v19, %v1261_v52  ;;  %v1288_v28 = vmul.f32 %v2770_v31, %v1287_v1  ;;  %v1297_v48 = vmul.f32 %v2784_v6, %v2759_v55  ;;  %vm1294_vm1 = vmor %vm1292_vm13, %vm1293_vm14 }
 0x282   :  { %v1407_v34 = vmul.f32 %v1265_v25, %v2648_v36  ;;  %v1275_v63 = vsel %vm1274_vm10, %v1563_v15, %v1271_v21  ;;  %v1308_v29 = vmul.f32 %v2776_v10, %v1307_v56  ;;  %1574 = vrsqrt.f32 %v2781_v60 }
 0x283   :  { %v1285_v2 = vsel %vm1284_vm12, %v1565_v11, %v1281_v58  ;;  %v1408_v45 = vmul.f32 %v1275_v63, %v2658_v59  ;;  %v1203_v23 = vpop.xlane.xlu2 %1202  ;;  %v1289_v19 = vmul.f32 0.5, %v1288_v28  ;;  %v1298_v36 = vmul.f32 %v2784_v6, %v1297_v48  ;;  %v1205_v12 = vpop.xlane.xlu0 %1204 }
 0x284   :  { %v1409_v27 = vmul.f32 %v1285_v2, %v2655_v18  ;;  %1424 = vst [vmem:[#allocation5 + $0x188] sm:$0xff] %v1407_v34  ;;  %v1309_v15 = vmul.f32 0.5, %v1308_v29  ;;  %v1207_v59 = vpop.xlane.xlu1 %1206  ;;  %v1224_v42 = vmul.f32 0.0078125, %v1203_v23  ;;  %v1225_v17 = vmul.f32 0.0078125, %v1205_v12 }
 0x285   :  { %1425 = vst [vmem:[#allocation5 + $0x190] sm:$0xff] %v1408_v45  ;;  %v1290_v57 = vsub.f32 1.5, %v1289_v19  ;;  %v1299_v18 = vmul.f32 0.5, %v1298_v36  ;;  %v1226_v44 = vmul.f32 0.0078125, %v1207_v59  ;;  %vm1313_vm15 = vweird.f32 %v2776_v10 }
 0x286   :  { %v2806_v11 = vpop.eup %1572  ;;  %1426 = vst [vmem:[#allocation5 + $0x198] sm:$0xff] %v1409_v27  ;;  %v1310_v49 = vsub.f32 1.5, %v1309_v15  ;;  %1576 = vrsqrt.f32 %v2804_v61  ;;  %vm1303_vm0 = vweird.f32 %v2784_v6  ;;  %v2822_v22 = vadd.f32 1e-05, %v1224_v42  ;;  %vm1314_vm2 = vmor %vm1312_vm11, %vm1313_vm15 }
 0x287   :  { %v1317_v3 = vmul.f32 %v2806_v11, %v2772_v53  ;;  %v1291_v47 = vmul.f32 %v2770_v31, %v1290_v57  ;;  %v1300_v39 = vsub.f32 1.5, %v1299_v18  ;;  %v2814_v46 = vadd.f32 1e-05, %v1226_v44  ;;  %vm1304_vm4 = vmor %vm1302_vm3, %vm1303_vm0 }
 0x288   :  { %v1311_v38 = vmul.f32 %v2776_v10, %v1310_v49  ;;  %v2824_v35 = vadd.f32 1e-05, %v1225_v17  ;;  %v1575_v16 = vpop.eup %1574  ;;  %vm1323_vm5 = vweird.f32 %v2806_v11  ;;  %vm1322_vm6 = vweird.f32 %v2772_v53 }
 0x289   :  { %v1318_v30 = vmul.f32 %v2806_v11, %v1317_v3  ;;  %v1295_v32 = vsel %vm1294_vm1, %v2770_v31, %v1291_v47  ;;  %v1301_v37 = vmul.f32 %v2784_v6, %v1300_v39  ;;  %1578 = vrsqrt.f32 %v2814_v46  ;;  %vm1324_vm8 = vmor %vm1322_vm6, %vm1323_vm5 }
 0x28a   :  { %v1315_v9 = vsel %vm1314_vm2, %v2776_v10, %v1311_v38  ;;  %v1410_v50 = vmul.f32 %v1295_v32, %v2679_v0  ;;  %v1337_v54 = vmul.f32 %v1575_v16, %v2781_v60  ;;  %1580 = vrsqrt.f32 %v2822_v22 }
 0x28b   :  { %v1412_v20 = vmul.f32 %v1315_v9, %v2683_v43  ;;  %v1305_v24 = vsel %vm1304_vm4, %v2784_v6, %v1301_v37  ;;  %v1319_v31 = vmul.f32 0.5, %v1318_v30  ;;  %v1209_v8 = vpop.xlane.xlu2 %1208  ;;  %1582 = vrsqrt.f32 %v2824_v35  ;;  %v1211_v10 = vpop.xlane.xlu0 %1210 }
 0x28c   :  { %v1577_v55 = vpop.eup %1576  ;;  %1427 = vst [vmem:[#allocation5 + $0x1a0] sm:$0xff] %v1410_v50  ;;  %v1411_v52 = vmul.f32 %v1305_v24, %v2675_v13  ;;  %v1338_v1 = vmul.f32 %v1575_v16, %v1337_v54  ;;  %v1213_v0 = vpop.xlane.xlu1 %1212  ;;  %v1227_v25 = vmul.f32 0.0078125, %v1209_v8  ;;  %v1228_v34 = vmul.f32 0.0078125, %v1211_v10 }
 0x28d   :  { %1429 = vst [vmem:[#allocation5 + $0x1b0] sm:$0xff] %v1412_v20  ;;  %v1320_v21 = vsub.f32 1.5, %v1319_v31  ;;  %v1327_v43 = vmul.f32 %v1577_v55, %v2804_v61  ;;  %v1229_v58 = vmul.f32 0.0078125, %v1213_v0  ;;  %vm1343_vm7 = vweird.f32 %v1575_v16 }
 0x28e   :  { %1428 = vst [vmem:[#allocation5 + $0x1a8] sm:$0xff] %v1411_v52  ;;  %v1339_v6 = vmul.f32 0.5, %v1338_v1  ;;  %vm1342_vm9 = vweird.f32 %v2781_v60  ;;  %v2851_v23 = vadd.f32 1e-05, %v1227_v25  ;;  %vm1333_vm11 = vweird.f32 %v1577_v55 }
 0x28f   :  { %v1579_v56 = vpop.eup %1578  ;;  %v1321_v41 = vmul.f32 %v2806_v11, %v1320_v21  ;;  %v1328_v13 = vmul.f32 %v1577_v55, %v1327_v43  ;;  %v2847_v48 = vadd.f32 1e-05, %v1229_v58  ;;  %vm1344_vm10 = vmor %vm1342_vm9, %vm1343_vm7  ;;  %v2856_v42 = vadd.f32 1e-05, %v1228_v34 }
 0x290   :  { %v1340_v63 = vsub.f32 1.5, %v1339_v6  ;;  %v1367_v28 = vmul.f32 %v1579_v56, %v2814_v46  ;;  %v1581_v2 = vpop.eup %1580  ;;  %vm1332_vm12 = vweird.f32 %v2804_v61  ;;  %vm1373_vm14 = vweird.f32 %v1579_v56 }
 0x291   :  { %v1325_v45 = vsel %vm1324_vm8, %v2806_v11, %v1321_v41  ;;  %v1329_v29 = vmul.f32 0.5, %v1328_v13  ;;  %v1583_v27 = vpop.eup %1582  ;;  %v1347_v12 = vmul.f32 %v1581_v2, %v2822_v22  ;;  %1584 = vrsqrt.f32 %v2847_v48  ;;  %vm1334_vm13 = vmor %vm1332_vm12, %vm1333_vm11 }
 0x292   :  { %v1341_v19 = vmul.f32 %v1575_v16, %v1340_v63  ;;  %v1413_v53 = vmul.f32 %v1325_v45, %v2699_v33  ;;  %v1368_v36 = vmul.f32 %v1579_v56, %v1367_v28  ;;  %v1357_v59 = vmul.f32 %v1583_v27, %v2824_v35 }
 0x293   :  { %v1330_v15 = vsub.f32 1.5, %v1329_v29  ;;  %v1348_v57 = vmul.f32 %v1581_v2, %v1347_v12  ;;  %1586 = vrsqrt.f32 %v2851_v23  ;;  %vm1372_vm15 = vweird.f32 %v2814_v46 }
 0x294   :  { %v1345_v60 = vsel %vm1344_vm10, %v1575_v16, %v1341_v19  ;;  %1430 = vst [vmem:[#allocation5 + $0x1b8] sm:$0xff] %v1413_v53  ;;  %v1369_v11 = vmul.f32 0.5, %v1368_v36  ;;  %v1358_v33 = vmul.f32 %v1583_v27, %v1357_v59  ;;  %1588 = vrsqrt.f32 %v2856_v42  ;;  %vm1374_vm1 = vmor %vm1372_vm15, %vm1373_vm14 }
 0x295   :  { %v1415_v18 = vmul.f32 %v1345_v60, %v2702_v62  ;;  %v1331_v44 = vmul.f32 %v1577_v55, %v1330_v15  ;;  %v1349_v49 = vmul.f32 0.5, %v1348_v57  ;;  %vm1353_vm0 = vweird.f32 %v1581_v2 }
 0x296   :  { %v1370_v17 = vsub.f32 1.5, %v1369_v11  ;;  %v1359_v47 = vmul.f32 0.5, %v1358_v33  ;;  %vm1363_vm2 = vweird.f32 %v1583_v27  ;;  %vm1352_vm3 = vweird.f32 %v2822_v22 }
 0x297   :  { %1432 = vst [vmem:[#allocation5 + $0x1c8] sm:$0xff] %v1415_v18  ;;  %v1335_v3 = vsel %vm1334_vm13, %v1577_v55, %v1331_v44  ;;  %v1350_v38 = vsub.f32 1.5, %v1349_v49  ;;  %v1585_v30 = vpop.eup %1584  ;;  %vm1354_vm4 = vmor %vm1352_vm3, %vm1353_vm0  ;;  %vm1362_vm5 = vweird.f32 %v2824_v35  ;;  %vm1402_vm8 = vweird.f32 %v2847_v48 }
 0x298   :  { %v1414_v39 = vmul.f32 %v1335_v3, %v2696_v5  ;;  %v1371_v62 = vmul.f32 %v1579_v56, %v1370_v17  ;;  %v1360_v61 = vsub.f32 1.5, %v1359_v47  ;;  %v1397_v5 = vmul.f32 %v1585_v30, %v2847_v48  ;;  %vm1364_vm6 = vmor %vm1362_vm5, %vm1363_vm2 }
 0x299   :  { %v1351_v32 = vmul.f32 %v1581_v2, %v1350_v38  ;;  %v1587_v9 = vpop.eup %1586  ;;  %vm1403_vm7 = vweird.f32 %v1585_v30  ;;  %vm1382_vm12 = vweird.f32 %v2851_v23  ;;  %vm1392_vm14 = vweird.f32 %v2856_v42 }
 0x29a   :  { %1431 = vst [vmem:[#allocation5 + $0x1c0] sm:$0xff] %v1414_v39  ;;  %v1375_v16 = vsel %vm1374_vm1, %v1579_v56, %v1371_v62  ;;  %v1361_v46 = vmul.f32 %v1583_v27, %v1360_v61  ;;  %v1589_v54 = vpop.eup %1588  ;;  %v1398_v31 = vmul.f32 %v1585_v30, %v1397_v5  ;;  %v1377_v8 = vmul.f32 %v1587_v9, %v2851_v23  ;;  %vm1404_vm10 = vmor %vm1402_vm8, %vm1403_vm7 }
 0x29b   :  { %v1418_v37 = vmul.f32 %v1375_v16, %v2717_v26  ;;  %v1355_v50 = vsel %vm1354_vm4, %v1581_v2, %v1351_v32  ;;  %v1387_v26 = vmul.f32 %v1589_v54, %v2856_v42  ;;  %vm1383_vm9 = vweird.f32 %v1587_v9 }
 0x29c   :  { %v1416_v20 = vmul.f32 %v1355_v50, %v2714_v51  ;;  %v1365_v24 = vsel %vm1364_vm6, %v1583_v27, %v1361_v46  ;;  %v1399_v55 = vmul.f32 0.5, %v1398_v31  ;;  %v1378_v35 = vmul.f32 %v1587_v9, %v1377_v8  ;;  %vm1384_vm13 = vmor %vm1382_vm12, %vm1383_vm9 }
 0x29d   :  { %1435 = vst [vmem:[#allocation5 + $0x1e0] sm:$0xff] %v1418_v37  ;;  %v1417_v22 = vmul.f32 %v1365_v24, %v2711_v40  ;;  %v1388_v52 = vmul.f32 %v1589_v54, %v1387_v26  ;;  %vm1393_vm11 = vweird.f32 %v1589_v54 }
 0x29e   :  { %1433 = vst [vmem:[#allocation5 + $0x1d0] sm:$0xff] %v1416_v20  ;;  %v1400_v1 = vsub.f32 1.5, %v1399_v55  ;;  %v1379_v0 = vmul.f32 0.5, %v1378_v35  ;;  %vm1394_vm15 = vmor %vm1392_vm14, %vm1393_vm11 }
 0x29f   :  { %1434 = vst [vmem:[#allocation5 + $0x1d8] sm:$0xff] %v1417_v22  ;;  %v1389_v10 = vmul.f32 0.5, %v1388_v52 }
 0x2a0   :  { %v1401_v21 = vmul.f32 %v1585_v30, %v1400_v1  ;;  %v1380_v51 = vsub.f32 1.5, %v1379_v0 }
 0x2a1   :  { %v1390_v43 = vsub.f32 1.5, %v1389_v10 }
 0x2a2   :  { %v1405_v40 = vsel %vm1404_vm10, %v1585_v30, %v1401_v21  ;;  %v1381_v6 = vmul.f32 %v1587_v9, %v1380_v51 }
 0x2a3   :  { %v1421_v58 = vmul.f32 %v1405_v40, %v2732_v14  ;;  %v1391_v25 = vmul.f32 %v1589_v54, %v1390_v43 }
 0x2a4   :  { %v1385_v56 = vsel %vm1384_vm13, %v1587_v9, %v1381_v6 }
 0x2a5   :  { %1438 = vst [vmem:[#allocation5 + $0x1f8] sm:$0xff] %v1421_v58  ;;  %v1419_v41 = vmul.f32 %v1385_v56, %v2729_v7  ;;  %v1395_v13 = vsel %vm1394_vm15, %v1589_v54, %v1391_v25 }
 0x2a6   :  { %v1420_v34 = vmul.f32 %v1395_v13, %v2726_v4 }
 0x2a7   :  { %1436 = vst [vmem:[#allocation5 + $0x1e8] sm:$0xff] %v1419_v41 }
 0x2a8   :  { %1437 = vst [vmem:[#allocation5 + $0x1f0] sm:$0xff] %v1420_v34 }
 0x2a9   :  { %1451 = dma.vmem_to_hbm [thread:$0]  %s1444_s13, 8192, %s1446_s16, [#allocation4], %s1656_s11, %s1656_s11, %s1657_s12  }
 0x2aa   :  { %1653 = dma.done.wait [#allocation4], 8192  }
 0x2ab   :  { %1654 = vsyncadd [#allocation4], 4294959104 }
 0x2ac   :  { %1456 = vsyncpa [#allocation3], 1 }
 0x2ad   :  { %1457 = vsyncpa [#allocation4], 1 }

</bundles_post_ra>
